<compile_context>
chip_gen: v6e
topology: v6e:2x2x1
jax: 0.10.0
libtpu: 0.0.40
codegen_flags: <defaults>
</compile_context>

<pallas_src>
import jax
import jax.numpy as jnp
import numpy as np
from jax.experimental import pallas as pl
from jax.experimental.pallas import tpu as pltpu


def _sigmoid(z):
    return 1.0 / (1.0 + jnp.exp(-z))


def cat_kernel(scal_ref, gauss_ref, ccoef_ref, w1_ref, w2_ref, wc_ref, cs_ref,
               x_ref, o_ref, pad_x_ref, v_pad_ref):
    # scal_ref : SMEM (5,)  = [s_alpha, s_beta, s_gamma, cw_mix, sw_mix]
    # gauss_ref: SMEM (GK,) = fixed gaussian taps
    # ccoef_ref: VMEM (3,1) = [c_alpha, c_beta, c_gamma]
    # w1_ref   : VMEM (C//r, C)   mlp conv1 (1x1)
    # w2_ref   : VMEM (C, C//r)   mlp conv2 (1x1)
    # wc_ref   : VMEM (K, C, C)   conv (1,K) weight, wc[t, out_c, in_c]
    # cs_ref   : VMEM (K, C, 1)   wc[t].sum(in_c) (precomputed column sums)
    # x_ref    : VMEM (TB, C, W)
    TB, C, W = x_ref.shape
    K = wc_ref.shape[0]
    GK = gauss_ref.shape[0]
    P = K // 2
    PG = GK // 2
    f32 = jnp.float32

    s_alpha = scal_ref[0]
    s_beta = scal_ref[1]
    s_gamma = scal_ref[2]
    cw_mix = scal_ref[3]          # exp(c_w)/(exp(c_w)+exp(s_w))
    sw_mix = scal_ref[4]          # exp(s_w)/(exp(c_w)+exp(s_w))

    # One-hot columns for assembling the fused (C,3) MLP operand and the lane
    # index used for the conv edge masks -- all built in-register.
    col3 = jax.lax.broadcasted_iota(jnp.int32, (1, 3), 1)
    e0 = (col3 == 0).astype(f32)
    e1 = (col3 == 1).astype(f32)
    e2 = (col3 == 2).astype(f32)
    lane = jax.lax.broadcasted_iota(jnp.int32, (1, W), 1)

    # Zero only the pad-buffer border columns; the interiors are fully
    # rewritten for every batch element below, the borders never are.
    if PG > 0:
        pad_x_ref[:, 0:PG] = jnp.zeros((C, PG), f32)
        pad_x_ref[:, PG + W:PG + W + PG] = jnp.zeros((C, PG), f32)
    if P > 0:
        v_pad_ref[:, 0:P] = jnp.zeros((1, P), f32)
        v_pad_ref[:, P + W:P + W + P] = jnp.zeros((1, P), f32)

    for b in range(TB):                     # unrolled; batches are independent
        X = x_ref[b]                        # (C, W) f32

        # ---- Gaussian blur along W (depthwise (1,GK) conv, zero padding) ----
        pad_x_ref[:, PG:PG + W] = X
        xb = gauss_ref[0] * pad_x_ref[:, 0:W]
        for t in range(1, GK):
            xb = xb + gauss_ref[t] * pad_x_ref[:, t:t + W]
        gmp_in = jnp.max(xb, axis=-1, keepdims=True)                  # (C,1)

        # ---------------- channel branch ----------------
        gap_in = jnp.mean(X, axis=-1, keepdims=True)                  # (C,1)

        # entropy of softmax over W via logsumexp: H = log(S) - sum(e*(x-m))/S
        m_w = jnp.max(X, axis=-1, keepdims=True)
        e_w = jnp.exp(X - m_w)
        s_w = jnp.sum(e_w, axis=-1, keepdims=True)                    # (C,1)
        t_w = jnp.sum(e_w * (X - m_w), axis=-1, keepdims=True)        # (C,1)
        ent_c = jnp.log(s_w) - t_w * (1.0 / s_w)                      # (C,1)
        e_min = jnp.min(ent_c, axis=0, keepdims=True)                 # (1,1)
        e_max = jnp.max(ent_c, axis=0, keepdims=True)
        gep_in = (ent_c - e_min) * (1.0 / (e_max - e_min))            # (C,1)

        # fused MLP: one (C,3) operand instead of three (C,1) matvecs, and the
        # alpha/beta/gamma combine folded into a (3,1) matmul.
        feats = gap_in * e0 + gmp_in * e1 + gep_in * e2               # (C,3)
        h = jnp.maximum(
            jnp.dot(w1_ref[...], feats, preferred_element_type=f32), 0.0)
        mo = jnp.dot(w2_ref[...], h, preferred_element_type=f32)      # (C,3)
        chan_pre = jnp.dot(mo, ccoef_ref[...],
                           preferred_element_type=f32)                # (C,1)
        channel_score = _sigmoid(chan_pre)                            # (C,1)

        # ---------------- spatial branch ----------------
        s_gap = jnp.mean(X, axis=0, keepdims=True)                    # (1,W)

        m_c = jnp.max(X, axis=0, keepdims=True)                       # (1,W)
        e_c = jnp.exp(X - m_c)
        s_c = jnp.sum(e_c, axis=0, keepdims=True)                     # (1,W)
        t_c = jnp.sum(e_c * (X - m_c), axis=0, keepdims=True)         # (1,W)
        s_ent = jnp.log(s_c) - t_c * (1.0 / s_c)                      # (1,W)
        s_min = jnp.min(s_ent, axis=-1, keepdims=True)                # (1,1)
        s_max = jnp.max(s_ent, axis=-1, keepdims=True)
        s_gep = (s_ent - s_min) * (1.0 / (s_max - s_min))             # (1,W)

        # spatial_pre = u + v is rank-2, so the (1,K) channel-mixing conv
        # reduces to K matvecs (wc[t] @ u) plus K rank-1 updates with the
        # precomputed column sums cs[t] and the shifted/zero-padded v.
        u = s_beta * gmp_in                                           # (C,1)
        v = -s_alpha * s_gap + s_gamma * s_gep                        # (1,W)
        v_pad_ref[:, P:P + W] = v

        sconv = jnp.zeros((C, W), f32)
        for t in range(K):
            sh = t - P
            a_t = jnp.dot(wc_ref[t], u, preferred_element_type=f32)   # (C,1)
            m_t = ((lane >= -sh) & (lane < W - sh)).astype(f32)       # (1,W)
            v_t = v_pad_ref[:, t:t + W]                               # (1,W)
            sconv = sconv + a_t * m_t + cs_ref[t] * v_t
        spatial_score = _sigmoid(sconv)                               # (C,W)

        scale = channel_score * cw_mix + spatial_score * sw_mix       # (C,W)
        o_ref[b] = (scale * X).astype(o_ref.dtype)


def cat_pallas(x_nchw, gauss, w1, w2, wc_k, theta, tb=None):
    b, c, h, w = x_nchw.shape
    assert h == 1, "gauss_filter (Conv2d with in_channels=1) forces H == 1"
    x = x_nchw.reshape(b, c, w).astype(jnp.float32)
    cr = w1.shape[0]
    k = wc_k.shape[0]
    gk = gauss.shape[0]

    # Batch elements per grid step (amortizes per-step pipeline overhead).
    if tb is None:
        tb = next(d for d in (8, 4, 2, 1) if b % d == 0)
    grid = (b // tb,)

    # Pure scalar-parameter math (independent of x) stays in the wrapper:
    # c_w / s_w mixing weights are a 2-element softmax of scalar parameters.
    ew = jnp.exp(theta[6:8])
    mix = ew / jnp.sum(ew)
    scal = jnp.concatenate([theta[3:6], mix]).astype(jnp.float32)   # s_a,s_b,s_g,cw,sw
    ccoef = theta[0:3].reshape(3, 1).astype(jnp.float32)            # c_a,c_b,c_g
    cs = jnp.sum(wc_k, axis=2)[..., None].astype(jnp.float32)       # (K,C,1) column sums

    out = pl.pallas_call(
        cat_kernel,
        out_shape=jax.ShapeDtypeStruct((b, c, w), jnp.float32),
        grid_spec=pltpu.PrefetchScalarGridSpec(
            num_scalar_prefetch=0,
            grid=grid,
            in_specs=[
                pl.BlockSpec(memory_space=pltpu.MemorySpace.SMEM),     # scalars (5,)
                pl.BlockSpec(memory_space=pltpu.MemorySpace.SMEM),     # gaussian taps (GK,)
                pl.BlockSpec((3, 1), lambda i: (0, 0)),                # channel mix coefs
                pl.BlockSpec((cr, c), lambda i: (0, 0)),               # mlp W1
                pl.BlockSpec((c, cr), lambda i: (0, 0)),               # mlp W2
                pl.BlockSpec((k, c, c), lambda i: (0, 0, 0)),          # conv weight
                pl.BlockSpec((k, c, 1), lambda i: (0, 0, 0)),          # conv col-sums
                pl.BlockSpec((tb, c, w), lambda i: (i, 0, 0)),         # x tile (TB batches)
            ],
            out_specs=pl.BlockSpec((tb, c, w), lambda i: (i, 0, 0)),
            scratch_shapes=[
                pltpu.VMEM((c, w + 2 * (gk // 2)), jnp.float32),       # blur pad buffer
                pltpu.VMEM((1, w + 2 * (k // 2)), jnp.float32),        # v pad buffer
            ],
        ),
        compiler_params=pltpu.CompilerParams(
            dimension_semantics=("parallel",)),
    )(scal, gauss.astype(jnp.float32), ccoef, w1.astype(jnp.float32),
      w2.astype(jnp.float32), wc_k.astype(jnp.float32), cs, x)
    return out.reshape(b, c, 1, w)


def cat_reference(x_nchw, gauss, w1, w2, wc_k, theta):
    """Plain-JAX reference mirroring the PyTorch forward (H == 1)."""
    b, c, h, w = x_nchw.shape
    x = x_nchw.reshape(b, c, w).astype(jnp.float32)
    c_alpha, c_beta, c_gamma, s_alpha, s_beta, s_gamma, c_wp, s_wp = (theta[i] for i in range(8))
    K = wc_k.shape[0]
    P = K // 2
    hi = jax.lax.Precision.HIGHEST

    xp = jnp.pad(x, ((0, 0), (0, 0), (2, 2)))
    xb = sum(gauss[t] * xp[:, :, t:t + w] for t in range(5))

    c_gap_in = jnp.mean(x, axis=-1, keepdims=True)
    c_gmp_in = jnp.max(xb, axis=-1, keepdims=True)
    p_w = jax.nn.softmax(x, axis=-1)
    ent_c = -jnp.sum(p_w * jnp.log(p_w), axis=-1, keepdims=True)
    c_gep_in = (ent_c - jnp.min(ent_c, axis=1, keepdims=True)) / (
        jnp.max(ent_c, axis=1, keepdims=True) - jnp.min(ent_c, axis=1, keepdims=True))

    def mlp(v):
        hdn = jnp.maximum(jnp.einsum('rc,bcx->brx', w1, v, precision=hi), 0.0)
        return jnp.einsum('cr,brx->bcx', w2, hdn, precision=hi)

    channel_score = _sigmoid(mlp(c_gap_in) * c_alpha + mlp(c_gmp_in) * c_beta
                             + mlp(c_gep_in) * c_gamma)                 # (b,c,1)

    s_gap = jnp.mean(x, axis=1, keepdims=True)                          # (b,1,w)
    s_gmp = c_gmp_in                                                     # (b,c,1)
    p_c = jax.nn.softmax(x, axis=1)
    s_gep = -jnp.sum(p_c * jnp.log(p_c), axis=1, keepdims=True)          # (b,1,w)
    s_gep = (s_gep - jnp.min(s_gep, axis=-1, keepdims=True)) / (
        jnp.max(s_gep, axis=-1, keepdims=True) - jnp.min(s_gep, axis=-1, keepdims=True))
    spatial_pre = -s_gap * s_alpha + s_gmp * s_beta + s_gep * s_gamma    # (b,c,w)

    spp = jnp.pad(spatial_pre, ((0, 0), (0, 0), (P, P)))
    sconv = sum(jnp.einsum('oi,biw->bow', wc_k[t], spp[:, :, t:t + w], precision=hi)
                for t in range(K))
    spatial_score = _sigmoid(sconv)

    ew = jnp.exp(jnp.stack([c_wp, s_wp]))
    mix = ew / jnp.sum(ew)
    scale = channel_score * mix[0] + spatial_score * mix[1]
    return (scale * x).reshape(b, c, 1, w)


if __name__ == "__main__":
    B, C, H, W = 2, 4, 1, 16          # H must be 1 (see layout comment)
    RED, KSIZE = 2, 3
    CR = C // RED

    key = jax.random.PRNGKey(0)
    k_x, k_w1, k_w2, k_wc, k_t = jax.random.split(key, 5)

    x = jax.random.normal(k_x, (B, C, H, W), jnp.float32)

    # Fixed gaussian (1,5) filter, sigma=1.0  (== _get_gaussian_kernel1d(5, 1.0))
    lin = np.linspace(-2.0, 2.0, 5)
    pdf = np.exp(-0.5 * lin ** 2)
    gauss = jnp.asarray(pdf / pdf.sum(), jnp.float32)

    # mlp 1x1 convs (bias=False) and the (1,K) conv weight (wc_k[t, out_c, in_c]).
    w1 = jax.random.normal(k_w1, (CR, C), jnp.float32) * 0.5
    w2 = jax.random.normal(k_w2, (C, CR), jnp.float32) * 0.5
    wc_k = jax.random.normal(k_wc, (KSIZE, C, C), jnp.float32) * 0.3
    # c_alpha..s_w are nn.Parameter(torch.zeros(1)) in the module (which makes
    # the output trivially 0.5*x); nonzero values exercise the full data path.
    theta = jax.random.normal(k_t, (8,), jnp.float32) * 0.5

    out = jax.block_until_ready(cat_pallas(x, gauss, w1, w2, wc_k, theta))
    ref = cat_reference(x, gauss, w1, w2, wc_k, theta)

    err = float(jnp.max(jnp.abs(out - ref)))
    assert out.shape == x.shape and err < 1e-3, f"mismatch: max abs err {err}"
    print("KERNEL_OK")
</pallas_src>

<mosaic_0001>
module attributes {stable_mosaic.version = 11 : i64} {
  func.func @cat_kernel(%arg0: i32, %arg1: memref<5xf32, #tpu.memory_space<smem>>, %arg2: memref<5xf32, #tpu.memory_space<smem>>, %arg3: memref<3x1xf32, #tpu.memory_space<vmem>>, %arg4: memref<2x4xf32, #tpu.memory_space<vmem>>, %arg5: memref<4x2xf32, #tpu.memory_space<vmem>>, %arg6: memref<3x4x4xf32, #tpu.memory_space<vmem>>, %arg7: memref<3x4x1xf32, #tpu.memory_space<vmem>>, %arg8: memref<2x4x16xf32, #tpu.memory_space<vmem>>, %arg9: memref<2x4x16xf32, #tpu.memory_space<vmem>>, %arg10: memref<4x20xf32, #tpu.memory_space<vmem>>, %arg11: memref<1x18xf32, #tpu.memory_space<vmem>>) attributes {dimension_semantics = [#tpu.dimension_semantics<parallel>], iteration_bounds = array<i64: 1>, scalar_prefetch = 0 : i64, scratch_operands = 2 : i64, tpu.core_type = #tpu.core_type<tc>, window_params = [{transform_indices = @transform_0, window_bounds = array<i64: 5>}, {transform_indices = @transform_1, window_bounds = array<i64: 5>}, {pipeline_mode = #tpu.pipeline_mode<synchronous>, transform_indices = @transform_2, window_bounds = array<i64: 3, 1>}, {pipeline_mode = #tpu.pipeline_mode<synchronous>, transform_indices = @transform_3, window_bounds = array<i64: 2, 4>}, {pipeline_mode = #tpu.pipeline_mode<synchronous>, transform_indices = @transform_4, window_bounds = array<i64: 4, 2>}, {pipeline_mode = #tpu.pipeline_mode<synchronous>, transform_indices = @transform_5, window_bounds = array<i64: 3, 4, 4>}, {pipeline_mode = #tpu.pipeline_mode<synchronous>, transform_indices = @transform_6, window_bounds = array<i64: 3, 4, 1>}, {transform_indices = @transform_7, window_bounds = array<i64: 2, 4, 16>}, {transform_indices = @transform_8, window_bounds = array<i64: 2, 4, 16>}]} {
    %c0 = arith.constant 0 : index
    %0 = memref.load %arg1[%c0] : memref<5xf32, #tpu.memory_space<smem>>
    %c1 = arith.constant 1 : index
    %1 = memref.load %arg1[%c1] : memref<5xf32, #tpu.memory_space<smem>>
    %c2 = arith.constant 2 : index
    %2 = memref.load %arg1[%c2] : memref<5xf32, #tpu.memory_space<smem>>
    %c3 = arith.constant 3 : index
    %3 = memref.load %arg1[%c3] : memref<5xf32, #tpu.memory_space<smem>>
    %c4 = arith.constant 4 : index
    %4 = memref.load %arg1[%c4] : memref<5xf32, #tpu.memory_space<smem>>
    %5 = tpu.iota {dimensions = array<i32: 1>} : vector<1x3xi32>
    %c0_i32 = arith.constant 0 : i32
    %6 = vector.broadcast %c0_i32 : i32 to vector<1x3xi32>
    %7 = arith.cmpi eq, %5, %6 : vector<1x3xi32>
    %8 = arith.extui %7 : vector<1x3xi1> to vector<1x3xi32>
    %9 = arith.sitofp %8 : vector<1x3xi32> to vector<1x3xf32>
    %c1_i32 = arith.constant 1 : i32
    %10 = vector.broadcast %c1_i32 : i32 to vector<1x3xi32>
    %11 = arith.cmpi eq, %5, %10 : vector<1x3xi32>
    %12 = arith.extui %11 : vector<1x3xi1> to vector<1x3xi32>
    %13 = arith.sitofp %12 : vector<1x3xi32> to vector<1x3xf32>
    %c2_i32 = arith.constant 2 : i32
    %14 = vector.broadcast %c2_i32 : i32 to vector<1x3xi32>
    %15 = arith.cmpi eq, %5, %14 : vector<1x3xi32>
    %16 = arith.extui %15 : vector<1x3xi1> to vector<1x3xi32>
    %17 = arith.sitofp %16 : vector<1x3xi32> to vector<1x3xf32>
    %18 = tpu.iota {dimensions = array<i32: 1>} : vector<1x16xi32>
    %cst = arith.constant 0.000000e+00 : f32
    %19 = vector.broadcast %cst : f32 to vector<4x2xf32>
    %c0_0 = arith.constant 0 : index
    %c0_1 = arith.constant 0 : index
    %20 = vector.load %arg10[%c0_0, %c0_1] : memref<4x20xf32, #tpu.memory_space<vmem>>, vector<4x2xf32>
    tpu.vector_store %arg10[%c0_0, %c0_1], %19 {strides = array<i32>} : memref<4x20xf32, #tpu.memory_space<vmem>>, vector<4x2xf32>,
    %cst_2 = arith.constant 0.000000e+00 : f32
    %21 = vector.broadcast %cst_2 : f32 to vector<4x2xf32>
    %c0_3 = arith.constant 0 : index
    %c18 = arith.constant 18 : index
    %22 = vector.load %arg10[%c0_3, %c18] : memref<4x20xf32, #tpu.memory_space<vmem>>, vector<4x2xf32>
    tpu.vector_store %arg10[%c0_3, %c18], %21 {strides = array<i32>} : memref<4x20xf32, #tpu.memory_space<vmem>>, vector<4x2xf32>,
    %cst_4 = arith.constant 0.000000e+00 : f32
    %23 = vector.broadcast %cst_4 : f32 to vector<1x1xf32>
    %c0_5 = arith.constant 0 : index
    %c0_6 = arith.constant 0 : index
    %24 = vector.load %arg11[%c0_5, %c0_6] : memref<1x18xf32, #tpu.memory_space<vmem>>, vector<1x1xf32>
    tpu.vector_store %arg11[%c0_5, %c0_6], %23 {strides = array<i32>} : memref<1x18xf32, #tpu.memory_space<vmem>>, vector<1x1xf32>,
    %cst_7 = arith.constant 0.000000e+00 : f32
    %25 = vector.broadcast %cst_7 : f32 to vector<1x1xf32>
    %c0_8 = arith.constant 0 : index
    %c17 = arith.constant 17 : index
    %26 = vector.load %arg11[%c0_8, %c17] : memref<1x18xf32, #tpu.memory_space<vmem>>, vector<1x1xf32>
    tpu.vector_store %arg11[%c0_8, %c17], %25 {strides = array<i32>} : memref<1x18xf32, #tpu.memory_space<vmem>>, vector<1x1xf32>,
    %c0_9 = arith.constant 0 : index
    %c0_10 = arith.constant 0 : index
    %c0_11 = arith.constant 0 : index
    %27 = vector.load %arg8[%c0_9, %c0_10, %c0_11] : memref<2x4x16xf32, #tpu.memory_space<vmem>>, vector<1x4x16xf32>
    %28 = vector.shape_cast %27 : vector<1x4x16xf32> to vector<4x16xf32>
    %c0_12 = arith.constant 0 : index
    %c2_13 = arith.constant 2 : index
    %29 = vector.load %arg10[%c0_12, %c2_13] : memref<4x20xf32, #tpu.memory_space<vmem>>, vector<4x16xf32>
    tpu.vector_store %arg10[%c0_12, %c2_13], %28 {strides = array<i32>} : memref<4x20xf32, #tpu.memory_space<vmem>>, vector<4x16xf32>,
    %c0_14 = arith.constant 0 : index
    %30 = memref.load %arg2[%c0_14] : memref<5xf32, #tpu.memory_space<smem>>
    %c0_15 = arith.constant 0 : index
    %c0_16 = arith.constant 0 : index
    %31 = vector.load %arg10[%c0_15, %c0_16] : memref<4x20xf32, #tpu.memory_space<vmem>>, vector<4x16xf32>
    %32 = vector.broadcast %30 : f32 to vector<4x16xf32>
    %33 = arith.mulf %32, %31 : vector<4x16xf32>
    %c1_17 = arith.constant 1 : index
    %34 = memref.load %arg2[%c1_17] : memref<5xf32, #tpu.memory_space<smem>>
    %c0_18 = arith.constant 0 : index
    %c1_19 = arith.constant 1 : index
    %35 = vector.load %arg10[%c0_18, %c1_19] : memref<4x20xf32, #tpu.memory_space<vmem>>, vector<4x16xf32>
    %36 = vector.broadcast %34 : f32 to vector<4x16xf32>
    %37 = arith.mulf %36, %35 : vector<4x16xf32>
    %38 = arith.addf %33, %37 : vector<4x16xf32>
    %c2_20 = arith.constant 2 : index
    %39 = memref.load %arg2[%c2_20] : memref<5xf32, #tpu.memory_space<smem>>
    %c0_21 = arith.constant 0 : index
    %c2_22 = arith.constant 2 : index
    %40 = vector.load %arg10[%c0_21, %c2_22] : memref<4x20xf32, #tpu.memory_space<vmem>>, vector<4x16xf32>
    %41 = vector.broadcast %39 : f32 to vector<4x16xf32>
    %42 = arith.mulf %41, %40 : vector<4x16xf32>
    %43 = arith.addf %38, %42 : vector<4x16xf32>
    %c3_23 = arith.constant 3 : index
    %44 = memref.load %arg2[%c3_23] : memref<5xf32, #tpu.memory_space<smem>>
    %c0_24 = arith.constant 0 : index
    %c3_25 = arith.constant 3 : index
    %45 = vector.load %arg10[%c0_24, %c3_25] : memref<4x20xf32, #tpu.memory_space<vmem>>, vector<4x16xf32>
    %46 = vector.broadcast %44 : f32 to vector<4x16xf32>
    %47 = arith.mulf %46, %45 : vector<4x16xf32>
    %48 = arith.addf %43, %47 : vector<4x16xf32>
    %c4_26 = arith.constant 4 : index
    %49 = memref.load %arg2[%c4_26] : memref<5xf32, #tpu.memory_space<smem>>
    %c0_27 = arith.constant 0 : index
    %c4_28 = arith.constant 4 : index
    %50 = vector.load %arg10[%c0_27, %c4_28] : memref<4x20xf32, #tpu.memory_space<vmem>>, vector<4x16xf32>
    %51 = vector.broadcast %49 : f32 to vector<4x16xf32>
    %52 = arith.mulf %51, %50 : vector<4x16xf32>
    %53 = arith.addf %48, %52 : vector<4x16xf32>
    %cst_29 = arith.constant dense<0xFF800000> : vector<4xf32>
    %54 = vector.multi_reduction <maximumf>, %53, %cst_29 [1] : vector<4x16xf32> to vector<4xf32>
    %55 = vector.shape_cast %54 : vector<4xf32> to vector<4x1xf32>
    %cst_30 = arith.constant dense<0.000000e+00> : vector<4xf32>
    %56 = vector.multi_reduction <add>, %28, %cst_30 [1] : vector<4x16xf32> to vector<4xf32>
    %57 = vector.shape_cast %56 : vector<4xf32> to vector<4x1xf32>
    %cst_31 = arith.constant 1.600000e+01 : f32
    %58 = vector.broadcast %cst_31 : f32 to vector<4x1xf32>
    %59 = arith.divf %57, %58 : vector<4x1xf32>
    %cst_32 = arith.constant dense<0xFF800000> : vector<4xf32>
    %60 = vector.multi_reduction <maximumf>, %28, %cst_32 [1] : vector<4x16xf32> to vector<4xf32>
    %61 = vector.shape_cast %60 : vector<4xf32> to vector<4x1xf32>
    %62 = vector.broadcast %61 : vector<4x1xf32> to vector<4x16xf32>
    %63 = arith.subf %28, %62 : vector<4x16xf32>
    %64 = math.exp %63 : vector<4x16xf32>
    %cst_33 = arith.constant dense<0.000000e+00> : vector<4xf32>
    %65 = vector.multi_reduction <add>, %64, %cst_33 [1] : vector<4x16xf32> to vector<4xf32>
    %66 = vector.shape_cast %65 : vector<4xf32> to vector<4x1xf32>
    %67 = vector.broadcast %61 : vector<4x1xf32> to vector<4x16xf32>
    %68 = arith.subf %28, %67 : vector<4x16xf32>
    %69 = arith.mulf %64, %68 : vector<4x16xf32>
    %cst_34 = arith.constant dense<0.000000e+00> : vector<4xf32>
    %70 = vector.multi_reduction <add>, %69, %cst_34 [1] : vector<4x16xf32> to vector<4xf32>
    %71 = vector.shape_cast %70 : vector<4xf32> to vector<4x1xf32>
    %72 = math.log %66 : vector<4x1xf32>
    %cst_35 = arith.constant 1.000000e+00 : f32
    %73 = vector.broadcast %cst_35 : f32 to vector<4x1xf32>
    %74 = arith.divf %73, %66 : vector<4x1xf32>
    %75 = arith.mulf %71, %74 : vector<4x1xf32>
    %76 = arith.subf %72, %75 : vector<4x1xf32>
    %cst_36 = arith.constant dense<0x7F800000> : vector<1xf32>
    %77 = vector.multi_reduction <minimumf>, %76, %cst_36 [0] : vector<4x1xf32> to vector<1xf32>
    %78 = vector.shape_cast %77 : vector<1xf32> to vector<1x1xf32>
    %cst_37 = arith.constant dense<0xFF800000> : vector<1xf32>
    %79 = vector.multi_reduction <maximumf>, %76, %cst_37 [0] : vector<4x1xf32> to vector<1xf32>
    %80 = vector.shape_cast %79 : vector<1xf32> to vector<1x1xf32>
    %81 = vector.broadcast %78 : vector<1x1xf32> to vector<4x1xf32>
    %82 = arith.subf %76, %81 : vector<4x1xf32>
    %83 = arith.subf %80, %78 : vector<1x1xf32>
    %cst_38 = arith.constant 1.000000e+00 : f32
    %84 = vector.broadcast %cst_38 : f32 to vector<1x1xf32>
    %85 = arith.divf %84, %83 : vector<1x1xf32>
    %86 = vector.broadcast %85 : vector<1x1xf32> to vector<4x1xf32>
    %87 = arith.mulf %82, %86 : vector<4x1xf32>
    %88 = vector.broadcast %59 : vector<4x1xf32> to vector<4x3xf32>
    %89 = vector.broadcast %9 : vector<1x3xf32> to vector<4x3xf32>
    %90 = arith.mulf %88, %89 : vector<4x3xf32>
    %91 = vector.broadcast %55 : vector<4x1xf32> to vector<4x3xf32>
    %92 = vector.broadcast %13 : vector<1x3xf32> to vector<4x3xf32>
    %93 = arith.mulf %91, %92 : vector<4x3xf32>
    %94 = arith.addf %90, %93 : vector<4x3xf32>
    %95 = vector.broadcast %87 : vector<4x1xf32> to vector<4x3xf32>
    %96 = vector.broadcast %17 : vector<1x3xf32> to vector<4x3xf32>
    %97 = arith.mulf %95, %96 : vector<4x3xf32>
    %98 = arith.addf %94, %97 : vector<4x3xf32>
    %c0_39 = arith.constant 0 : index
    %c0_40 = arith.constant 0 : index
    %99 = vector.load %arg4[%c0_39, %c0_40] : memref<2x4xf32, #tpu.memory_space<vmem>>, vector<2x4xf32>
    %cst_41 = arith.constant dense<0.000000e+00> : vector<2x3xf32>
    %100 = tpu.matmul %99, %98, %cst_41 {dimension_numbers = #tpu.dot_dimension_numbers<[1], [0], [0], [1], [0, 0, 1, 1], [], []>} : vector<2x4xf32>, vector<4x3xf32>, vector<2x3xf32> -> vector<2x3xf32>
    %cst_42 = arith.constant 0.000000e+00 : f32
    %101 = vector.broadcast %cst_42 : f32 to vector<2x3xf32>
    %102 = arith.maximumf %100, %101 : vector<2x3xf32>
    %c0_43 = arith.constant 0 : index
    %c0_44 = arith.constant 0 : index
    %103 = vector.load %arg5[%c0_43, %c0_44] : memref<4x2xf32, #tpu.memory_space<vmem>>, vector<4x2xf32>
    %cst_45 = arith.constant dense<0.000000e+00> : vector<4x3xf32>
    %104 = tpu.matmul %103, %102, %cst_45 {dimension_numbers = #tpu.dot_dimension_numbers<[1], [0], [0], [1], [0, 0, 1, 1], [], []>} : vector<4x2xf32>, vector<2x3xf32>, vector<4x3xf32> -> vector<4x3xf32>
    %c0_46 = arith.constant 0 : index
    %c0_47 = arith.constant 0 : index
    %105 = vector.load %arg3[%c0_46, %c0_47] : memref<3x1xf32, #tpu.memory_space<vmem>>, vector<3x1xf32>
    %cst_48 = arith.constant dense<0.000000e+00> : vector<4x1xf32>
    %106 = tpu.matmul %104, %105, %cst_48 {dimension_numbers = #tpu.dot_dimension_numbers<[1], [0], [0], [1], [0, 0, 1, 1], [], []>} : vector<4x3xf32>, vector<3x1xf32>, vector<4x1xf32> -> vector<4x1xf32>
    %cst_49 = arith.constant 0.000000e+00 : f32
    %107 = vector.broadcast %cst_49 : f32 to vector<4x1xf32>
    %108 = arith.subf %107, %106 : vector<4x1xf32>
    %109 = math.exp %108 : vector<4x1xf32>
    %cst_50 = arith.constant 1.000000e+00 : f32
    %110 = vector.broadcast %cst_50 : f32 to vector<4x1xf32>
    %111 = arith.addf %110, %109 : vector<4x1xf32>
    %cst_51 = arith.constant 1.000000e+00 : f32
    %112 = vector.broadcast %cst_51 : f32 to vector<4x1xf32>
    %113 = arith.divf %112, %111 : vector<4x1xf32>
    %cst_52 = arith.constant dense<0.000000e+00> : vector<16xf32>
    %114 = vector.multi_reduction <add>, %28, %cst_52 [0] : vector<4x16xf32> to vector<16xf32>
    %115 = vector.shape_cast %114 : vector<16xf32> to vector<1x16xf32>
    %cst_53 = arith.constant 4.000000e+00 : f32
    %116 = vector.broadcast %cst_53 : f32 to vector<1x16xf32>
    %117 = arith.divf %115, %116 : vector<1x16xf32>
    %cst_54 = arith.constant dense<0xFF800000> : vector<16xf32>
    %118 = vector.multi_reduction <maximumf>, %28, %cst_54 [0] : vector<4x16xf32> to vector<16xf32>
    %119 = vector.shape_cast %118 : vector<16xf32> to vector<1x16xf32>
    %120 = vector.broadcast %119 : vector<1x16xf32> to vector<4x16xf32>
    %121 = arith.subf %28, %120 : vector<4x16xf32>
    %122 = math.exp %121 : vector<4x16xf32>
    %cst_55 = arith.constant dense<0.000000e+00> : vector<16xf32>
    %123 = vector.multi_reduction <add>, %122, %cst_55 [0] : vector<4x16xf32> to vector<16xf32>
    %124 = vector.shape_cast %123 : vector<16xf32> to vector<1x16xf32>
    %125 = vector.broadcast %119 : vector<1x16xf32> to vector<4x16xf32>
    %126 = arith.subf %28, %125 : vector<4x16xf32>
    %127 = arith.mulf %122, %126 : vector<4x16xf32>
    %cst_56 = arith.constant dense<0.000000e+00> : vector<16xf32>
    %128 = vector.multi_reduction <add>, %127, %cst_56 [0] : vector<4x16xf32> to vector<16xf32>
    %129 = vector.shape_cast %128 : vector<16xf32> to vector<1x16xf32>
    %130 = math.log %124 : vector<1x16xf32>
    %cst_57 = arith.constant 1.000000e+00 : f32
    %131 = vector.broadcast %cst_57 : f32 to vector<1x16xf32>
    %132 = arith.divf %131, %124 : vector<1x16xf32>
    %133 = arith.mulf %129, %132 : vector<1x16xf32>
    %134 = arith.subf %130, %133 : vector<1x16xf32>
    %cst_58 = arith.constant dense<0x7F800000> : vector<1xf32>
    %135 = vector.multi_reduction <minimumf>, %134, %cst_58 [1] : vector<1x16xf32> to vector<1xf32>
    %136 = vector.shape_cast %135 : vector<1xf32> to vector<1x1xf32>
    %cst_59 = arith.constant dense<0xFF800000> : vector<1xf32>
    %137 = vector.multi_reduction <maximumf>, %134, %cst_59 [1] : vector<1x16xf32> to vector<1xf32>
    %138 = vector.shape_cast %137 : vector<1xf32> to vector<1x1xf32>
    %139 = vector.broadcast %136 : vector<1x1xf32> to vector<1x16xf32>
    %140 = arith.subf %134, %139 : vector<1x16xf32>
    %141 = arith.subf %138, %136 : vector<1x1xf32>
    %cst_60 = arith.constant 1.000000e+00 : f32
    %142 = vector.broadcast %cst_60 : f32 to vector<1x1xf32>
    %143 = arith.divf %142, %141 : vector<1x1xf32>
    %144 = vector.broadcast %143 : vector<1x1xf32> to vector<1x16xf32>
    %145 = arith.mulf %140, %144 : vector<1x16xf32>
    %146 = vector.broadcast %1 : f32 to vector<4x1xf32>
    %147 = arith.mulf %146, %55 : vector<4x1xf32>
    %cst_61 = arith.constant 0.000000e+00 : f32
    %148 = arith.subf %cst_61, %0 : f32
    %149 = vector.broadcast %148 : f32 to vector<1x16xf32>
    %150 = arith.mulf %149, %117 : vector<1x16xf32>
    %151 = vector.broadcast %2 : f32 to vector<1x16xf32>
    %152 = arith.mulf %151, %145 : vector<1x16xf32>
    %153 = arith.addf %150, %152 : vector<1x16xf32>
    %c0_62 = arith.constant 0 : index
    %c1_63 = arith.constant 1 : index
    %154 = vector.load %arg11[%c0_62, %c1_63] : memref<1x18xf32, #tpu.memory_space<vmem>>, vector<1x16xf32>
    tpu.vector_store %arg11[%c0_62, %c1_63], %153 {strides = array<i32>} : memref<1x18xf32, #tpu.memory_space<vmem>>, vector<1x16xf32>,
    %cst_64 = arith.constant 0.000000e+00 : f32
    %155 = vector.broadcast %cst_64 : f32 to vector<4x16xf32>
    %c0_65 = arith.constant 0 : index
    %c0_66 = arith.constant 0 : index
    %c0_67 = arith.constant 0 : index
    %156 = vector.load %arg6[%c0_65, %c0_66, %c0_67] : memref<3x4x4xf32, #tpu.memory_space<vmem>>, vector<1x4x4xf32>
    %157 = vector.shape_cast %156 : vector<1x4x4xf32> to vector<4x4xf32>
    %cst_68 = arith.constant dense<0.000000e+00> : vector<4x1xf32>
    %158 = tpu.matmul %157, %147, %cst_68 {dimension_numbers = #tpu.dot_dimension_numbers<[1], [0], [0], [1], [0, 0, 1, 1], [], []>} : vector<4x4xf32>, vector<4x1xf32>, vector<4x1xf32> -> vector<4x1xf32>
    %c1_i32_69 = arith.constant 1 : i32
    %159 = vector.broadcast %c1_i32_69 : i32 to vector<1x16xi32>
    %160 = arith.cmpi sge, %18, %159 : vector<1x16xi32>
    %c17_i32 = arith.constant 17 : i32
    %161 = vector.broadcast %c17_i32 : i32 to vector<1x16xi32>
    %162 = arith.cmpi slt, %18, %161 : vector<1x16xi32>
    %163 = arith.andi %160, %162 : vector<1x16xi1>
    %164 = arith.extui %163 : vector<1x16xi1> to vector<1x16xi32>
    %165 = arith.sitofp %164 : vector<1x16xi32> to vector<1x16xf32>
    %c0_70 = arith.constant 0 : index
    %c0_71 = arith.constant 0 : index
    %166 = vector.load %arg11[%c0_70, %c0_71] : memref<1x18xf32, #tpu.memory_space<vmem>>, vector<1x16xf32>
    %167 = vector.broadcast %158 : vector<4x1xf32> to vector<4x16xf32>
    %168 = vector.broadcast %165 : vector<1x16xf32> to vector<4x16xf32>
    %169 = arith.mulf %167, %168 : vector<4x16xf32>
    %170 = arith.addf %155, %169 : vector<4x16xf32>
    %c0_72 = arith.constant 0 : index
    %c0_73 = arith.constant 0 : index
    %c0_74 = arith.constant 0 : index
    %171 = vector.load %arg7[%c0_72, %c0_73, %c0_74] : memref<3x4x1xf32, #tpu.memory_space<vmem>>, vector<1x4x1xf32>
    %172 = vector.shape_cast %171 : vector<1x4x1xf32> to vector<4x1xf32>
    %173 = vector.broadcast %172 : vector<4x1xf32> to vector<4x16xf32>
    %174 = vector.broadcast %166 : vector<1x16xf32> to vector<4x16xf32>
    %175 = arith.mulf %173, %174 : vector<4x16xf32>
    %176 = arith.addf %170, %175 : vector<4x16xf32>
    %c1_75 = arith.constant 1 : index
    %c0_76 = arith.constant 0 : index
    %c0_77 = arith.constant 0 : index
    %177 = vector.load %arg6[%c1_75, %c0_76, %c0_77] : memref<3x4x4xf32, #tpu.memory_space<vmem>>, vector<1x4x4xf32>
    %178 = vector.shape_cast %177 : vector<1x4x4xf32> to vector<4x4xf32>
    %cst_78 = arith.constant dense<0.000000e+00> : vector<4x1xf32>
    %179 = tpu.matmul %178, %147, %cst_78 {dimension_numbers = #tpu.dot_dimension_numbers<[1], [0], [0], [1], [0, 0, 1, 1], [], []>} : vector<4x4xf32>, vector<4x1xf32>, vector<4x1xf32> -> vector<4x1xf32>
    %c0_i32_79 = arith.constant 0 : i32
    %180 = vector.broadcast %c0_i32_79 : i32 to vector<1x16xi32>
    %181 = arith.cmpi sge, %18, %180 : vector<1x16xi32>
    %c16_i32 = arith.constant 16 : i32
    %182 = vector.broadcast %c16_i32 : i32 to vector<1x16xi32>
    %183 = arith.cmpi slt, %18, %182 : vector<1x16xi32>
    %184 = arith.andi %181, %183 : vector<1x16xi1>
    %185 = arith.extui %184 : vector<1x16xi1> to vector<1x16xi32>
    %186 = arith.sitofp %185 : vector<1x16xi32> to vector<1x16xf32>
    %c0_80 = arith.constant 0 : index
    %c1_81 = arith.constant 1 : index
    %187 = vector.load %arg11[%c0_80, %c1_81] : memref<1x18xf32, #tpu.memory_space<vmem>>, vector<1x16xf32>
    %188 = vector.broadcast %179 : vector<4x1xf32> to vector<4x16xf32>
    %189 = vector.broadcast %186 : vector<1x16xf32> to vector<4x16xf32>
    %190 = arith.mulf %188, %189 : vector<4x16xf32>
    %191 = arith.addf %176, %190 : vector<4x16xf32>
    %c1_82 = arith.constant 1 : index
    %c0_83 = arith.constant 0 : index
    %c0_84 = arith.constant 0 : index
    %192 = vector.load %arg7[%c1_82, %c0_83, %c0_84] : memref<3x4x1xf32, #tpu.memory_space<vmem>>, vector<1x4x1xf32>
    %193 = vector.shape_cast %192 : vector<1x4x1xf32> to vector<4x1xf32>
    %194 = vector.broadcast %193 : vector<4x1xf32> to vector<4x16xf32>
    %195 = vector.broadcast %187 : vector<1x16xf32> to vector<4x16xf32>
    %196 = arith.mulf %194, %195 : vector<4x16xf32>
    %197 = arith.addf %191, %196 : vector<4x16xf32>
    %c2_85 = arith.constant 2 : index
    %c0_86 = arith.constant 0 : index
    %c0_87 = arith.constant 0 : index
    %198 = vector.load %arg6[%c2_85, %c0_86, %c0_87] : memref<3x4x4xf32, #tpu.memory_space<vmem>>, vector<1x4x4xf32>
    %199 = vector.shape_cast %198 : vector<1x4x4xf32> to vector<4x4xf32>
    %cst_88 = arith.constant dense<0.000000e+00> : vector<4x1xf32>
    %200 = tpu.matmul %199, %147, %cst_88 {dimension_numbers = #tpu.dot_dimension_numbers<[1], [0], [0], [1], [0, 0, 1, 1], [], []>} : vector<4x4xf32>, vector<4x1xf32>, vector<4x1xf32> -> vector<4x1xf32>
    %c-1_i32 = arith.constant -1 : i32
    %201 = vector.broadcast %c-1_i32 : i32 to vector<1x16xi32>
    %202 = arith.cmpi sge, %18, %201 : vector<1x16xi32>
    %c15_i32 = arith.constant 15 : i32
    %203 = vector.broadcast %c15_i32 : i32 to vector<1x16xi32>
    %204 = arith.cmpi slt, %18, %203 : vector<1x16xi32>
    %205 = arith.andi %202, %204 : vector<1x16xi1>
    %206 = arith.extui %205 : vector<1x16xi1> to vector<1x16xi32>
    %207 = arith.sitofp %206 : vector<1x16xi32> to vector<1x16xf32>
    %c0_89 = arith.constant 0 : index
    %c2_90 = arith.constant 2 : index
    %208 = vector.load %arg11[%c0_89, %c2_90] : memref<1x18xf32, #tpu.memory_space<vmem>>, vector<1x16xf32>
    %209 = vector.broadcast %200 : vector<4x1xf32> to vector<4x16xf32>
    %210 = vector.broadcast %207 : vector<1x16xf32> to vector<4x16xf32>
    %211 = arith.mulf %209, %210 : vector<4x16xf32>
    %212 = arith.addf %197, %211 : vector<4x16xf32>
    %c2_91 = arith.constant 2 : index
    %c0_92 = arith.constant 0 : index
    %c0_93 = arith.constant 0 : index
    %213 = vector.load %arg7[%c2_91, %c0_92, %c0_93] : memref<3x4x1xf32, #tpu.memory_space<vmem>>, vector<1x4x1xf32>
    %214 = vector.shape_cast %213 : vector<1x4x1xf32> to vector<4x1xf32>
    %215 = vector.broadcast %214 : vector<4x1xf32> to vector<4x16xf32>
    %216 = vector.broadcast %208 : vector<1x16xf32> to vector<4x16xf32>
    %217 = arith.mulf %215, %216 : vector<4x16xf32>
    %218 = arith.addf %212, %217 : vector<4x16xf32>
    %cst_94 = arith.constant 0.000000e+00 : f32
    %219 = vector.broadcast %cst_94 : f32 to vector<4x16xf32>
    %220 = arith.subf %219, %218 : vector<4x16xf32>
    %221 = math.exp %220 : vector<4x16xf32>
    %cst_95 = arith.constant 1.000000e+00 : f32
    %222 = vector.broadcast %cst_95 : f32 to vector<4x16xf32>
    %223 = arith.addf %222, %221 : vector<4x16xf32>
    %cst_96 = arith.constant 1.000000e+00 : f32
    %224 = vector.broadcast %cst_96 : f32 to vector<4x16xf32>
    %225 = arith.divf %224, %223 : vector<4x16xf32>
    %226 = vector.broadcast %3 : f32 to vector<4x1xf32>
    %227 = arith.mulf %113, %226 : vector<4x1xf32>
    %228 = vector.broadcast %4 : f32 to vector<4x16xf32>
    %229 = arith.mulf %225, %228 : vector<4x16xf32>
    %230 = vector.broadcast %227 : vector<4x1xf32> to vector<4x16xf32>
    %231 = arith.addf %230, %229 : vector<4x16xf32>
    %232 = arith.mulf %231, %28 : vector<4x16xf32>
    %c0_97 = arith.constant 0 : index
    %c0_98 = arith.constant 0 : index
    %c0_99 = arith.constant 0 : index
    %233 = vector.load %arg9[%c0_97, %c0_98, %c0_99] : memref<2x4x16xf32, #tpu.memory_space<vmem>>, vector<1x4x16xf32>
    %234 = vector.shape_cast %233 : vector<1x4x16xf32> to vector<4x16xf32>
    %235 = vector.shape_cast %232 : vector<4x16xf32> to vector<1x4x16xf32>
    tpu.vector_store %arg9[%c0_97, %c0_98, %c0_99], %235 {strides = array<i32>} : memref<2x4x16xf32, #tpu.memory_space<vmem>>, vector<1x4x16xf32>,
    %c1_100 = arith.constant 1 : index
    %c0_101 = arith.constant 0 : index
    %c0_102 = arith.constant 0 : index
    %236 = vector.load %arg8[%c1_100, %c0_101, %c0_102] : memref<2x4x16xf32, #tpu.memory_space<vmem>>, vector<1x4x16xf32>
    %237 = vector.shape_cast %236 : vector<1x4x16xf32> to vector<4x16xf32>
    %c0_103 = arith.constant 0 : index
    %c2_104 = arith.constant 2 : index
    %238 = vector.load %arg10[%c0_103, %c2_104] : memref<4x20xf32, #tpu.memory_space<vmem>>, vector<4x16xf32>
    tpu.vector_store %arg10[%c0_103, %c2_104], %237 {strides = array<i32>} : memref<4x20xf32, #tpu.memory_space<vmem>>, vector<4x16xf32>,
    %c0_105 = arith.constant 0 : index
    %239 = memref.load %arg2[%c0_105] : memref<5xf32, #tpu.memory_space<smem>>
    %c0_106 = arith.constant 0 : index
    %c0_107 = arith.constant 0 : index
    %240 = vector.load %arg10[%c0_106, %c0_107] : memref<4x20xf32, #tpu.memory_space<vmem>>, vector<4x16xf32>
    %241 = vector.broadcast %239 : f32 to vector<4x16xf32>
    %242 = arith.mulf %241, %240 : vector<4x16xf32>
    %c1_108 = arith.constant 1 : index
    %243 = memref.load %arg2[%c1_108] : memref<5xf32, #tpu.memory_space<smem>>
    %c0_109 = arith.constant 0 : index
    %c1_110 = arith.constant 1 : index
    %244 = vector.load %arg10[%c0_109, %c1_110] : memref<4x20xf32, #tpu.memory_space<vmem>>, vector<4x16xf32>
    %245 = vector.broadcast %243 : f32 to vector<4x16xf32>
    %246 = arith.mulf %245, %244 : vector<4x16xf32>
    %247 = arith.addf %242, %246 : vector<4x16xf32>
    %c2_111 = arith.constant 2 : index
    %248 = memref.load %arg2[%c2_111] : memref<5xf32, #tpu.memory_space<smem>>
    %c0_112 = arith.constant 0 : index
    %c2_113 = arith.constant 2 : index
    %249 = vector.load %arg10[%c0_112, %c2_113] : memref<4x20xf32, #tpu.memory_space<vmem>>, vector<4x16xf32>
    %250 = vector.broadcast %248 : f32 to vector<4x16xf32>
    %251 = arith.mulf %250, %249 : vector<4x16xf32>
    %252 = arith.addf %247, %251 : vector<4x16xf32>
    %c3_114 = arith.constant 3 : index
    %253 = memref.load %arg2[%c3_114] : memref<5xf32, #tpu.memory_space<smem>>
    %c0_115 = arith.constant 0 : index
    %c3_116 = arith.constant 3 : index
    %254 = vector.load %arg10[%c0_115, %c3_116] : memref<4x20xf32, #tpu.memory_space<vmem>>, vector<4x16xf32>
    %255 = vector.broadcast %253 : f32 to vector<4x16xf32>
    %256 = arith.mulf %255, %254 : vector<4x16xf32>
    %257 = arith.addf %252, %256 : vector<4x16xf32>
    %c4_117 = arith.constant 4 : index
    %258 = memref.load %arg2[%c4_117] : memref<5xf32, #tpu.memory_space<smem>>
    %c0_118 = arith.constant 0 : index
    %c4_119 = arith.constant 4 : index
    %259 = vector.load %arg10[%c0_118, %c4_119] : memref<4x20xf32, #tpu.memory_space<vmem>>, vector<4x16xf32>
    %260 = vector.broadcast %258 : f32 to vector<4x16xf32>
    %261 = arith.mulf %260, %259 : vector<4x16xf32>
    %262 = arith.addf %257, %261 : vector<4x16xf32>
    %cst_120 = arith.constant dense<0xFF800000> : vector<4xf32>
    %263 = vector.multi_reduction <maximumf>, %262, %cst_120 [1] : vector<4x16xf32> to vector<4xf32>
    %264 = vector.shape_cast %263 : vector<4xf32> to vector<4x1xf32>
    %cst_121 = arith.constant dense<0.000000e+00> : vector<4xf32>
    %265 = vector.multi_reduction <add>, %237, %cst_121 [1] : vector<4x16xf32> to vector<4xf32>
    %266 = vector.shape_cast %265 : vector<4xf32> to vector<4x1xf32>
    %cst_122 = arith.constant 1.600000e+01 : f32
    %267 = vector.broadcast %cst_122 : f32 to vector<4x1xf32>
    %268 = arith.divf %266, %267 : vector<4x1xf32>
    %cst_123 = arith.constant dense<0xFF800000> : vector<4xf32>
    %269 = vector.multi_reduction <maximumf>, %237, %cst_123 [1] : vector<4x16xf32> to vector<4xf32>
    %270 = vector.shape_cast %269 : vector<4xf32> to vector<4x1xf32>
    %271 = vector.broadcast %270 : vector<4x1xf32> to vector<4x16xf32>
    %272 = arith.subf %237, %271 : vector<4x16xf32>
    %273 = math.exp %272 : vector<4x16xf32>
    %cst_124 = arith.constant dense<0.000000e+00> : vector<4xf32>
    %274 = vector.multi_reduction <add>, %273, %cst_124 [1] : vector<4x16xf32> to vector<4xf32>
    %275 = vector.shape_cast %274 : vector<4xf32> to vector<4x1xf32>
    %276 = vector.broadcast %270 : vector<4x1xf32> to vector<4x16xf32>
    %277 = arith.subf %237, %276 : vector<4x16xf32>
    %278 = arith.mulf %273, %277 : vector<4x16xf32>
    %cst_125 = arith.constant dense<0.000000e+00> : vector<4xf32>
    %279 = vector.multi_reduction <add>, %278, %cst_125 [1] : vector<4x16xf32> to vector<4xf32>
    %280 = vector.shape_cast %279 : vector<4xf32> to vector<4x1xf32>
    %281 = math.log %275 : vector<4x1xf32>
    %cst_126 = arith.constant 1.000000e+00 : f32
    %282 = vector.broadcast %cst_126 : f32 to vector<4x1xf32>
    %283 = arith.divf %282, %275 : vector<4x1xf32>
    %284 = arith.mulf %280, %283 : vector<4x1xf32>
    %285 = arith.subf %281, %284 : vector<4x1xf32>
    %cst_127 = arith.constant dense<0x7F800000> : vector<1xf32>
    %286 = vector.multi_reduction <minimumf>, %285, %cst_127 [0] : vector<4x1xf32> to vector<1xf32>
    %287 = vector.shape_cast %286 : vector<1xf32> to vector<1x1xf32>
    %cst_128 = arith.constant dense<0xFF800000> : vector<1xf32>
    %288 = vector.multi_reduction <maximumf>, %285, %cst_128 [0] : vector<4x1xf32> to vector<1xf32>
    %289 = vector.shape_cast %288 : vector<1xf32> to vector<1x1xf32>
    %290 = vector.broadcast %287 : vector<1x1xf32> to vector<4x1xf32>
    %291 = arith.subf %285, %290 : vector<4x1xf32>
    %292 = arith.subf %289, %287 : vector<1x1xf32>
    %cst_129 = arith.constant 1.000000e+00 : f32
    %293 = vector.broadcast %cst_129 : f32 to vector<1x1xf32>
    %294 = arith.divf %293, %292 : vector<1x1xf32>
    %295 = vector.broadcast %294 : vector<1x1xf32> to vector<4x1xf32>
    %296 = arith.mulf %291, %295 : vector<4x1xf32>
    %297 = vector.broadcast %268 : vector<4x1xf32> to vector<4x3xf32>
    %298 = vector.broadcast %9 : vector<1x3xf32> to vector<4x3xf32>
    %299 = arith.mulf %297, %298 : vector<4x3xf32>
    %300 = vector.broadcast %264 : vector<4x1xf32> to vector<4x3xf32>
    %301 = vector.broadcast %13 : vector<1x3xf32> to vector<4x3xf32>
    %302 = arith.mulf %300, %301 : vector<4x3xf32>
    %303 = arith.addf %299, %302 : vector<4x3xf32>
    %304 = vector.broadcast %296 : vector<4x1xf32> to vector<4x3xf32>
    %305 = vector.broadcast %17 : vector<1x3xf32> to vector<4x3xf32>
    %306 = arith.mulf %304, %305 : vector<4x3xf32>
    %307 = arith.addf %303, %306 : vector<4x3xf32>
    %c0_130 = arith.constant 0 : index
    %c0_131 = arith.constant 0 : index
    %308 = vector.load %arg4[%c0_130, %c0_131] : memref<2x4xf32, #tpu.memory_space<vmem>>, vector<2x4xf32>
    %cst_132 = arith.constant dense<0.000000e+00> : vector<2x3xf32>
    %309 = tpu.matmul %308, %307, %cst_132 {dimension_numbers = #tpu.dot_dimension_numbers<[1], [0], [0], [1], [0, 0, 1, 1], [], []>} : vector<2x4xf32>, vector<4x3xf32>, vector<2x3xf32> -> vector<2x3xf32>
    %cst_133 = arith.constant 0.000000e+00 : f32
    %310 = vector.broadcast %cst_133 : f32 to vector<2x3xf32>
    %311 = arith.maximumf %309, %310 : vector<2x3xf32>
    %c0_134 = arith.constant 0 : index
    %c0_135 = arith.constant 0 : index
    %312 = vector.load %arg5[%c0_134, %c0_135] : memref<4x2xf32, #tpu.memory_space<vmem>>, vector<4x2xf32>
    %cst_136 = arith.constant dense<0.000000e+00> : vector<4x3xf32>
    %313 = tpu.matmul %312, %311, %cst_136 {dimension_numbers = #tpu.dot_dimension_numbers<[1], [0], [0], [1], [0, 0, 1, 1], [], []>} : vector<4x2xf32>, vector<2x3xf32>, vector<4x3xf32> -> vector<4x3xf32>
    %c0_137 = arith.constant 0 : index
    %c0_138 = arith.constant 0 : index
    %314 = vector.load %arg3[%c0_137, %c0_138] : memref<3x1xf32, #tpu.memory_space<vmem>>, vector<3x1xf32>
    %cst_139 = arith.constant dense<0.000000e+00> : vector<4x1xf32>
    %315 = tpu.matmul %313, %314, %cst_139 {dimension_numbers = #tpu.dot_dimension_numbers<[1], [0], [0], [1], [0, 0, 1, 1], [], []>} : vector<4x3xf32>, vector<3x1xf32>, vector<4x1xf32> -> vector<4x1xf32>
    %cst_140 = arith.constant 0.000000e+00 : f32
    %316 = vector.broadcast %cst_140 : f32 to vector<4x1xf32>
    %317 = arith.subf %316, %315 : vector<4x1xf32>
    %318 = math.exp %317 : vector<4x1xf32>
    %cst_141 = arith.constant 1.000000e+00 : f32
    %319 = vector.broadcast %cst_141 : f32 to vector<4x1xf32>
    %320 = arith.addf %319, %318 : vector<4x1xf32>
    %cst_142 = arith.constant 1.000000e+00 : f32
    %321 = vector.broadcast %cst_142 : f32 to vector<4x1xf32>
    %322 = arith.divf %321, %320 : vector<4x1xf32>
    %cst_143 = arith.constant dense<0.000000e+00> : vector<16xf32>
    %323 = vector.multi_reduction <add>, %237, %cst_143 [0] : vector<4x16xf32> to vector<16xf32>
    %324 = vector.shape_cast %323 : vector<16xf32> to vector<1x16xf32>
    %cst_144 = arith.constant 4.000000e+00 : f32
    %325 = vector.broadcast %cst_144 : f32 to vector<1x16xf32>
    %326 = arith.divf %324, %325 : vector<1x16xf32>
    %cst_145 = arith.constant dense<0xFF800000> : vector<16xf32>
    %327 = vector.multi_reduction <maximumf>, %237, %cst_145 [0] : vector<4x16xf32> to vector<16xf32>
    %328 = vector.shape_cast %327 : vector<16xf32> to vector<1x16xf32>
    %329 = vector.broadcast %328 : vector<1x16xf32> to vector<4x16xf32>
    %330 = arith.subf %237, %329 : vector<4x16xf32>
    %331 = math.exp %330 : vector<4x16xf32>
    %cst_146 = arith.constant dense<0.000000e+00> : vector<16xf32>
    %332 = vector.multi_reduction <add>, %331, %cst_146 [0] : vector<4x16xf32> to vector<16xf32>
    %333 = vector.shape_cast %332 : vector<16xf32> to vector<1x16xf32>
    %334 = vector.broadcast %328 : vector<1x16xf32> to vector<4x16xf32>
    %335 = arith.subf %237, %334 : vector<4x16xf32>
    %336 = arith.mulf %331, %335 : vector<4x16xf32>
    %cst_147 = arith.constant dense<0.000000e+00> : vector<16xf32>
    %337 = vector.multi_reduction <add>, %336, %cst_147 [0] : vector<4x16xf32> to vector<16xf32>
    %338 = vector.shape_cast %337 : vector<16xf32> to vector<1x16xf32>
    %339 = math.log %333 : vector<1x16xf32>
    %cst_148 = arith.constant 1.000000e+00 : f32
    %340 = vector.broadcast %cst_148 : f32 to vector<1x16xf32>
    %341 = arith.divf %340, %333 : vector<1x16xf32>
    %342 = arith.mulf %338, %341 : vector<1x16xf32>
    %343 = arith.subf %339, %342 : vector<1x16xf32>
    %cst_149 = arith.constant dense<0x7F800000> : vector<1xf32>
    %344 = vector.multi_reduction <minimumf>, %343, %cst_149 [1] : vector<1x16xf32> to vector<1xf32>
    %345 = vector.shape_cast %344 : vector<1xf32> to vector<1x1xf32>
    %cst_150 = arith.constant dense<0xFF800000> : vector<1xf32>
    %346 = vector.multi_reduction <maximumf>, %343, %cst_150 [1] : vector<1x16xf32> to vector<1xf32>
    %347 = vector.shape_cast %346 : vector<1xf32> to vector<1x1xf32>
    %348 = vector.broadcast %345 : vector<1x1xf32> to vector<1x16xf32>
    %349 = arith.subf %343, %348 : vector<1x16xf32>
    %350 = arith.subf %347, %345 : vector<1x1xf32>
    %cst_151 = arith.constant 1.000000e+00 : f32
    %351 = vector.broadcast %cst_151 : f32 to vector<1x1xf32>
    %352 = arith.divf %351, %350 : vector<1x1xf32>
    %353 = vector.broadcast %352 : vector<1x1xf32> to vector<1x16xf32>
    %354 = arith.mulf %349, %353 : vector<1x16xf32>
    %355 = vector.broadcast %1 : f32 to vector<4x1xf32>
    %356 = arith.mulf %355, %264 : vector<4x1xf32>
    %cst_152 = arith.constant 0.000000e+00 : f32
    %357 = arith.subf %cst_152, %0 : f32
    %358 = vector.broadcast %357 : f32 to vector<1x16xf32>
    %359 = arith.mulf %358, %326 : vector<1x16xf32>
    %360 = vector.broadcast %2 : f32 to vector<1x16xf32>
    %361 = arith.mulf %360, %354 : vector<1x16xf32>
    %362 = arith.addf %359, %361 : vector<1x16xf32>
    %c0_153 = arith.constant 0 : index
    %c1_154 = arith.constant 1 : index
    %363 = vector.load %arg11[%c0_153, %c1_154] : memref<1x18xf32, #tpu.memory_space<vmem>>, vector<1x16xf32>
    tpu.vector_store %arg11[%c0_153, %c1_154], %362 {strides = array<i32>} : memref<1x18xf32, #tpu.memory_space<vmem>>, vector<1x16xf32>,
    %cst_155 = arith.constant 0.000000e+00 : f32
    %364 = vector.broadcast %cst_155 : f32 to vector<4x16xf32>
    %c0_156 = arith.constant 0 : index
    %c0_157 = arith.constant 0 : index
    %c0_158 = arith.constant 0 : index
    %365 = vector.load %arg6[%c0_156, %c0_157, %c0_158] : memref<3x4x4xf32, #tpu.memory_space<vmem>>, vector<1x4x4xf32>
    %366 = vector.shape_cast %365 : vector<1x4x4xf32> to vector<4x4xf32>
    %cst_159 = arith.constant dense<0.000000e+00> : vector<4x1xf32>
    %367 = tpu.matmul %366, %356, %cst_159 {dimension_numbers = #tpu.dot_dimension_numbers<[1], [0], [0], [1], [0, 0, 1, 1], [], []>} : vector<4x4xf32>, vector<4x1xf32>, vector<4x1xf32> -> vector<4x1xf32>
    %c1_i32_160 = arith.constant 1 : i32
    %368 = vector.broadcast %c1_i32_160 : i32 to vector<1x16xi32>
    %369 = arith.cmpi sge, %18, %368 : vector<1x16xi32>
    %c17_i32_161 = arith.constant 17 : i32
    %370 = vector.broadcast %c17_i32_161 : i32 to vector<1x16xi32>
    %371 = arith.cmpi slt, %18, %370 : vector<1x16xi32>
    %372 = arith.andi %369, %371 : vector<1x16xi1>
    %373 = arith.extui %372 : vector<1x16xi1> to vector<1x16xi32>
    %374 = arith.sitofp %373 : vector<1x16xi32> to vector<1x16xf32>
    %c0_162 = arith.constant 0 : index
    %c0_163 = arith.constant 0 : index
    %375 = vector.load %arg11[%c0_162, %c0_163] : memref<1x18xf32, #tpu.memory_space<vmem>>, vector<1x16xf32>
    %376 = vector.broadcast %367 : vector<4x1xf32> to vector<4x16xf32>
    %377 = vector.broadcast %374 : vector<1x16xf32> to vector<4x16xf32>
    %378 = arith.mulf %376, %377 : vector<4x16xf32>
    %379 = arith.addf %364, %378 : vector<4x16xf32>
    %c0_164 = arith.constant 0 : index
    %c0_165 = arith.constant 0 : index
    %c0_166 = arith.constant 0 : index
    %380 = vector.load %arg7[%c0_164, %c0_165, %c0_166] : memref<3x4x1xf32, #tpu.memory_space<vmem>>, vector<1x4x1xf32>
    %381 = vector.shape_cast %380 : vector<1x4x1xf32> to vector<4x1xf32>
    %382 = vector.broadcast %381 : vector<4x1xf32> to vector<4x16xf32>
    %383 = vector.broadcast %375 : vector<1x16xf32> to vector<4x16xf32>
    %384 = arith.mulf %382, %383 : vector<4x16xf32>
    %385 = arith.addf %379, %384 : vector<4x16xf32>
    %c1_167 = arith.constant 1 : index
    %c0_168 = arith.constant 0 : index
    %c0_169 = arith.constant 0 : index
    %386 = vector.load %arg6[%c1_167, %c0_168, %c0_169] : memref<3x4x4xf32, #tpu.memory_space<vmem>>, vector<1x4x4xf32>
    %387 = vector.shape_cast %386 : vector<1x4x4xf32> to vector<4x4xf32>
    %cst_170 = arith.constant dense<0.000000e+00> : vector<4x1xf32>
    %388 = tpu.matmul %387, %356, %cst_170 {dimension_numbers = #tpu.dot_dimension_numbers<[1], [0], [0], [1], [0, 0, 1, 1], [], []>} : vector<4x4xf32>, vector<4x1xf32>, vector<4x1xf32> -> vector<4x1xf32>
    %c0_i32_171 = arith.constant 0 : i32
    %389 = vector.broadcast %c0_i32_171 : i32 to vector<1x16xi32>
    %390 = arith.cmpi sge, %18, %389 : vector<1x16xi32>
    %c16_i32_172 = arith.constant 16 : i32
    %391 = vector.broadcast %c16_i32_172 : i32 to vector<1x16xi32>
    %392 = arith.cmpi slt, %18, %391 : vector<1x16xi32>
    %393 = arith.andi %390, %392 : vector<1x16xi1>
    %394 = arith.extui %393 : vector<1x16xi1> to vector<1x16xi32>
    %395 = arith.sitofp %394 : vector<1x16xi32> to vector<1x16xf32>
    %c0_173 = arith.constant 0 : index
    %c1_174 = arith.constant 1 : index
    %396 = vector.load %arg11[%c0_173, %c1_174] : memref<1x18xf32, #tpu.memory_space<vmem>>, vector<1x16xf32>
    %397 = vector.broadcast %388 : vector<4x1xf32> to vector<4x16xf32>
    %398 = vector.broadcast %395 : vector<1x16xf32> to vector<4x16xf32>
    %399 = arith.mulf %397, %398 : vector<4x16xf32>
    %400 = arith.addf %385, %399 : vector<4x16xf32>
    %c1_175 = arith.constant 1 : index
    %c0_176 = arith.constant 0 : index
    %c0_177 = arith.constant 0 : index
    %401 = vector.load %arg7[%c1_175, %c0_176, %c0_177] : memref<3x4x1xf32, #tpu.memory_space<vmem>>, vector<1x4x1xf32>
    %402 = vector.shape_cast %401 : vector<1x4x1xf32> to vector<4x1xf32>
    %403 = vector.broadcast %402 : vector<4x1xf32> to vector<4x16xf32>
    %404 = vector.broadcast %396 : vector<1x16xf32> to vector<4x16xf32>
    %405 = arith.mulf %403, %404 : vector<4x16xf32>
    %406 = arith.addf %400, %405 : vector<4x16xf32>
    %c2_178 = arith.constant 2 : index
    %c0_179 = arith.constant 0 : index
    %c0_180 = arith.constant 0 : index
    %407 = vector.load %arg6[%c2_178, %c0_179, %c0_180] : memref<3x4x4xf32, #tpu.memory_space<vmem>>, vector<1x4x4xf32>
    %408 = vector.shape_cast %407 : vector<1x4x4xf32> to vector<4x4xf32>
    %cst_181 = arith.constant dense<0.000000e+00> : vector<4x1xf32>
    %409 = tpu.matmul %408, %356, %cst_181 {dimension_numbers = #tpu.dot_dimension_numbers<[1], [0], [0], [1], [0, 0, 1, 1], [], []>} : vector<4x4xf32>, vector<4x1xf32>, vector<4x1xf32> -> vector<4x1xf32>
    %c-1_i32_182 = arith.constant -1 : i32
    %410 = vector.broadcast %c-1_i32_182 : i32 to vector<1x16xi32>
    %411 = arith.cmpi sge, %18, %410 : vector<1x16xi32>
    %c15_i32_183 = arith.constant 15 : i32
    %412 = vector.broadcast %c15_i32_183 : i32 to vector<1x16xi32>
    %413 = arith.cmpi slt, %18, %412 : vector<1x16xi32>
    %414 = arith.andi %411, %413 : vector<1x16xi1>
    %415 = arith.extui %414 : vector<1x16xi1> to vector<1x16xi32>
    %416 = arith.sitofp %415 : vector<1x16xi32> to vector<1x16xf32>
    %c0_184 = arith.constant 0 : index
    %c2_185 = arith.constant 2 : index
    %417 = vector.load %arg11[%c0_184, %c2_185] : memref<1x18xf32, #tpu.memory_space<vmem>>, vector<1x16xf32>
    %418 = vector.broadcast %409 : vector<4x1xf32> to vector<4x16xf32>
    %419 = vector.broadcast %416 : vector<1x16xf32> to vector<4x16xf32>
    %420 = arith.mulf %418, %419 : vector<4x16xf32>
    %421 = arith.addf %406, %420 : vector<4x16xf32>
    %c2_186 = arith.constant 2 : index
    %c0_187 = arith.constant 0 : index
    %c0_188 = arith.constant 0 : index
    %422 = vector.load %arg7[%c2_186, %c0_187, %c0_188] : memref<3x4x1xf32, #tpu.memory_space<vmem>>, vector<1x4x1xf32>
    %423 = vector.shape_cast %422 : vector<1x4x1xf32> to vector<4x1xf32>
    %424 = vector.broadcast %423 : vector<4x1xf32> to vector<4x16xf32>
    %425 = vector.broadcast %417 : vector<1x16xf32> to vector<4x16xf32>
    %426 = arith.mulf %424, %425 : vector<4x16xf32>
    %427 = arith.addf %421, %426 : vector<4x16xf32>
    %cst_189 = arith.constant 0.000000e+00 : f32
    %428 = vector.broadcast %cst_189 : f32 to vector<4x16xf32>
    %429 = arith.subf %428, %427 : vector<4x16xf32>
    %430 = math.exp %429 : vector<4x16xf32>
    %cst_190 = arith.constant 1.000000e+00 : f32
    %431 = vector.broadcast %cst_190 : f32 to vector<4x16xf32>
    %432 = arith.addf %431, %430 : vector<4x16xf32>
    %cst_191 = arith.constant 1.000000e+00 : f32
    %433 = vector.broadcast %cst_191 : f32 to vector<4x16xf32>
    %434 = arith.divf %433, %432 : vector<4x16xf32>
    %435 = vector.broadcast %3 : f32 to vector<4x1xf32>
    %436 = arith.mulf %322, %435 : vector<4x1xf32>
    %437 = vector.broadcast %4 : f32 to vector<4x16xf32>
    %438 = arith.mulf %434, %437 : vector<4x16xf32>
    %439 = vector.broadcast %436 : vector<4x1xf32> to vector<4x16xf32>
    %440 = arith.addf %439, %438 : vector<4x16xf32>
    %441 = arith.mulf %440, %237 : vector<4x16xf32>
    %c1_192 = arith.constant 1 : index
    %c0_193 = arith.constant 0 : index
    %c0_194 = arith.constant 0 : index
    %442 = vector.load %arg9[%c1_192, %c0_193, %c0_194] : memref<2x4x16xf32, #tpu.memory_space<vmem>>, vector<1x4x16xf32>
    %443 = vector.shape_cast %442 : vector<1x4x16xf32> to vector<4x16xf32>
    %444 = vector.shape_cast %441 : vector<4x16xf32> to vector<1x4x16xf32>
    tpu.vector_store %arg9[%c1_192, %c0_193, %c0_194], %444 {strides = array<i32>} : memref<2x4x16xf32, #tpu.memory_space<vmem>>, vector<1x4x16xf32>,
    return
  }
  func.func @transform_0(%arg0: i32) -> i32 {
    %c0_i32 = arith.constant 0 : i32
    %c0_i32_0 = arith.constant 0 : i32
    return %c0_i32 : i32
  }
  func.func @transform_1(%arg0: i32) -> i32 {
    %c0_i32 = arith.constant 0 : i32
    %c0_i32_0 = arith.constant 0 : i32
    return %c0_i32 : i32
  }
  func.func @transform_2(%arg0: i32) -> (i32, i32) {
    %c0_i32 = arith.constant 0 : i32
    %c0_i32_0 = arith.constant 0 : i32
    %c0_i32_1 = arith.constant 0 : i32
    return %c0_i32, %c0_i32_0 : i32, i32
  }
  func.func @transform_3(%arg0: i32) -> (i32, i32) {
    %c0_i32 = arith.constant 0 : i32
    %c0_i32_0 = arith.constant 0 : i32
    %c0_i32_1 = arith.constant 0 : i32
    return %c0_i32, %c0_i32_0 : i32, i32
  }
  func.func @transform_4(%arg0: i32) -> (i32, i32) {
    %c0_i32 = arith.constant 0 : i32
    %c0_i32_0 = arith.constant 0 : i32
    %c0_i32_1 = arith.constant 0 : i32
    return %c0_i32, %c0_i32_0 : i32, i32
  }
  func.func @transform_5(%arg0: i32) -> (i32, i32, i32) {
    %c0_i32 = arith.constant 0 : i32
    %c0_i32_0 = arith.constant 0 : i32
    %c0_i32_1 = arith.constant 0 : i32
    %c0_i32_2 = arith.constant 0 : i32
    return %c0_i32, %c0_i32_0, %c0_i32_1 : i32, i32, i32
  }
  func.func @transform_6(%arg0: i32) -> (i32, i32, i32) {
    %c0_i32 = arith.constant 0 : i32
    %c0_i32_0 = arith.constant 0 : i32
    %c0_i32_1 = arith.constant 0 : i32
    %c0_i32_2 = arith.constant 0 : i32
    return %c0_i32, %c0_i32_0, %c0_i32_1 : i32, i32, i32
  }
  func.func @transform_7(%arg0: i32) -> (i32, i32, i32) {
    %c0_i32 = arith.constant 0 : i32
    %c0_i32_0 = arith.constant 0 : i32
    %c0_i32_1 = arith.constant 0 : i32
    return %arg0, %c0_i32, %c0_i32_0 : i32, i32, i32
  }
  func.func @transform_8(%arg0: i32) -> (i32, i32, i32) {
    %c0_i32 = arith.constant 0 : i32
    %c0_i32_0 = arith.constant 0 : i32
    %c0_i32_1 = arith.constant 0 : i32
    return %arg0, %c0_i32, %c0_i32_0 : i32, i32, i32
  }
}

</mosaic_0001>

<bundles_post_ra>
// kernel: tpu_custom_call.1
= control target key start
LH: loop header
LB: loop body
LE: loop exit
PB: predicated region body
PF: predicated region fallthrough
CT: control target
= control target key end

     0   :  { %13 = vsyncpa [#allocation6], 0  ;;  %s2113_s0 = inlined_call_operand.hbm [shape: f32[5], index: 0, kind: input, shape index: {}]   ;;  %s2114_s1 = inlined_call_operand.hbm [shape: f32[5], index: 1, kind: input, shape index: {}]   ;;  %s2115_s2 = inlined_call_operand.vmem [shape: f32[3,1], index: 2, kind: input, shape index: {}]   ;;  %s2116_s3 = inlined_call_operand.vmem [shape: f32[2,4], index: 3, kind: input, shape index: {}]   ;;  %s2117_s4 = inlined_call_operand.vmem [shape: f32[4,2], index: 4, kind: input, shape index: {}]   ;;  %s2118_s5 = inlined_call_operand.vmem [shape: f32[3,4,4], index: 5, kind: input, shape index: {}]   ;;  %s2119_s6 = inlined_call_operand.vmem [shape: f32[3,4,1], index: 6, kind: input, shape index: {}]   ;;  %s2120_s7 = inlined_call_operand.vmem [shape: f32[2,4,16], index: 7, kind: input, shape index: {}]   ;;  %s2121_s8 = inlined_call_operand.hbm [shape: f32[2,4,16], index: 8, kind: output, shape index: {}]  }
   0x1   :  { %14 = vsyncpa [#allocation8], 0 }
   0x2   :  { %15 = vsyncpa [#allocation5], 0  ;;  %s1751_s27 = smov [#allocation4]   ;;  %s1752_s30 = smov [#allocation7]  }
   0x3   :  { %23 = dma.hbm_to_smem %s2113_s0, 16, %s1751_s27, [#allocation6]  }
   0x4   :  { %31 = dma.hbm_to_smem %s2114_s1, 16, %s1752_s30, [#allocation8]  }
   0x5   :  { %1745 = dma.done.wait [#allocation6], 16  }
   0x6   :  { %1746 = vsyncadd [#allocation6], 4294967280 }
   0x7   :  { %1747 = dma.done.wait [#allocation8], 16  }
   0x8   :  { %1748 = vsyncadd [#allocation8], 4294967280 }
   0x9   :  { %50 = sfence }
   0xa   :  { %v1819_v0 = vld [vmem:[%s2120_s7] sm:$0xf]  ;;  %vm118_vm0 = vcmask 125952   ;;  %vm67_vm1 = vcmask 11264   ;;  %v1753_v2 = vmov 0.0   ;;  %vm69_vm2 = vcmask 158864  }
   0xb   :  { %v1823_v1 = vsel %vm118_vm0, %v1819_v0, -inf  ;;  %68 = vst.msk [vmem:[#allocation2] sm:$0xf] %vm67_vm1, %v1753_v2  ;;  %1585 = vmatprep.subr.mxu0 %v1753_v2  ;;  %1590 = vmatprep.subr.mxu1 %v1753_v2  ;;  %s1754_s0 = smov 2   ;;  %vm80_vm3 = vcmask 142352   ;;  %s1833_s1 = sld [smem:[#allocation7 + $0x1]]  ;;  %v56_v56 = vlaneseq }
   0xc   :  { %128 = vmax.xlane.f32.xlu0 %v1823_v1  ;;  %70 = vst.msk [vmem:[#allocation2] sm:$0xf] %vm69_vm2, %v1753_v2  ;;  %s1836_s13 = sld [smem:[#allocation7 + $0x2]]  ;;  %s1755_s16 = smov 127   ;;  %v1862_v20 = vsel %vm118_vm0, %v1819_v0, 0.0  ;;  %vm1759_vm4 = vmmov 0  }
   0xd   :  { %s1839_s14 = sld [smem:[#allocation7 + $0x3]]  ;;  %s1756_s17 = smov 126   ;;  %v1868_v21 = vld [vmem:[%s2120_s7 + $0x4] sm:$0xf]  ;;  %1587 = vmatprep.mubr.msk.f32.mxu0 %vm1759_vm4, %v1753_v2  ;;  %1592 = vmatprep.mubr.msk.f32.mxu1 %vm1759_vm4, %v1753_v2  ;;  %vm146_vm5 = vcmask 1043456   ;;  %v1889_v57 = vand.u32 127, %v56_v56 }
   0xe   :  { %s1844_s15 = sld [smem:[#allocation7 + $0x4]]  ;;  %s1757_s18 = smov 125   ;;  %v1872_v22 = vsel %vm118_vm0, %v1868_v21, -inf  ;;  %vm172_vm9 = vcmask 31744   ;;  %vm334_vm10 = vcmask 1042432   ;;  %vm255_vm11 = vcmask 1041408  }
   0xf   :  { %s1758_s19 = smov 124   ;;  %s1875_s22 = sld [smem:[#allocation7]]  ;;  %vm58_vm6 = vcmp.eq.s32.totalorder %v1889_v57, 0  ;;  %vm61_vm7 = vcmp.eq.s32.totalorder %v1889_v57, 1  ;;  %vm64_vm8 = vcmp.eq.s32.totalorder %v1889_v57, 2  ;;  %vm251_vm12 = vcmask 15360  }
  0x10   :  { %v1895_v62 = vsel %vm58_vm6, 1.0, %v1753_v2  ;;  %v1898_v63 = vsel %vm61_vm7, 1.0, %v1753_v2  ;;  %s1943_s26 = sld [smem:[#allocation4 + $0x1]]  ;;  %vm452_vm13 = vcmask 130048   ;;  %vm330_vm14 = vcmask 23552  }
  0x11   :  { %v87_v7 = vstv %s1833_s1  ;;  %vm71_vm15 = vcmask 0   ;;  %vm73_vm1 = vcmask 139400   ;;  %vm476_vm2 = vcmask 131080  }
  0x12   :  { %v95_v10 = vstv %s1836_s13  ;;  %s1509_s13 = sld [smem:[#allocation4 + $0x2]]  ;;  %72 = vst.msk [vmem:[#allocation3] sm:$0x1] %vm71_vm15, %v1753_v2  ;;  %vm658_vm6 = vcmp.lt.s32.totalorder %v1889_v57, 16  ;;  %vm758_vm7 = vcmp.lt.s32.totalorder %v1889_v57, 15 }
  0x13   :  { %v103_v13 = vstv %s1839_s14  ;;  %74 = vst.msk [vmem:[#allocation3] sm:$0x1] %vm73_vm1, %v1753_v2 }
  0x14   :  { %v111_v17 = vstv %s1844_s15  ;;  %s1761_s15 = smov 1  }
  0x15   :  { %v84_v24 = vstv %s1875_s22 }
  0x22   :  { %77 = vrot.lane.b32.xlu0 %v1819_v0, %s1754_s0 }
  0x95   :  { %v129_v3 = vpop.xlane.xlu0 %128 }
  0x96   :  { %v130_v4 = vsub.f32 %v1819_v0, %v129_v3 }
  0x98   :  { %v131_v5 = vmul.f32 1.442695, %v130_v4 }
  0x99   :  { %v78_v6 = vpop.permute.xlu0 %77 }
  0x9a   :  { %1661 = vpow2.f32 %v131_v5  ;;  %81 = vst.msk [vmem:[#allocation2] sm:$0xf] %vm80_vm3, %v78_v6  ;;  %v1901_v5 = vsel %vm64_vm8, 1.0, %v1753_v2 }
  0xa1   :  { %v83_v8 = vld [vmem:[#allocation2] sm:$0xf] }
  0xa2   :  { %v88_v9 = vmul.f32 %v87_v7, %v83_v8  ;;  %v96_v11 = vmul.f32 %v95_v10, %v83_v8  ;;  %v104_v16 = vmul.f32 %v103_v13, %v83_v8  ;;  %v112_v18 = vmul.f32 %v111_v17, %v83_v8 }
  0xa3   :  { %v85_v26 = vmul.f32 %v84_v24, %v83_v8 }
  0xa4   :  { %90 = vrot.lane.b32.xlu1 %v88_v9, %s1755_s16 }
  0xa7   :  { %v1662_v12 = vpop.eup %1661 }
  0xa8   :  { %98 = vrot.lane.b32.xlu1 %v96_v11, %s1756_s17  ;;  %v136_v14 = vmul.f32 %v1662_v12, %v130_v4  ;;  %v133_v19 = vsel %vm118_vm0, %v1662_v12, 0.0 }
  0xaa   :  { %v137_v15 = vsel %vm118_vm0, %v136_v14, 0.0 }
  0xab   :  { %138 = vadd.xlane.f32.xlu0 %v137_v15  ;;  %v171_v15 = vld [vmem:[%s2116_s3] sm:$0x3] }
  0xac   :  { %106 = vrot.lane.b32.xlu1 %v104_v16, %s1757_s18 }
  0xaf   :  { %851 = vmax.xlane.f32.xlu0 %v1872_v22 }
  0xb0   :  { %114 = vrot.lane.b32.xlu1 %v112_v18, %s1758_s19 }
  0xd4   :  { %134 = vadd.xlane.f32.xlu1 %v133_v19 }
  0xd8   :  { %123 = vadd.xlane.f32.xlu1 %v1862_v20 }
 0x116   :  { %v91_v23 = vpop.permute.xlu1 %90 }
 0x117   :  { %v93_v27 = vadd.f32 %v91_v23, %v85_v26 }
 0x11a   :  { %v99_v25 = vpop.permute.xlu1 %98 }
 0x11b   :  { %v101_v29 = vadd.f32 %v99_v25, %v93_v27 }
 0x11e   :  { %v107_v28 = vpop.permute.xlu1 %106 }
 0x11f   :  { %v109_v30 = vadd.f32 %v107_v28, %v101_v29 }
 0x122   :  { %v115_v31 = vpop.permute.xlu1 %114 }
 0x123   :  { %v117_v32 = vadd.f32 %v115_v31, %v109_v30 }
 0x125   :  { %v119_v33 = vsel %vm118_vm0, %v117_v32, -inf }
 0x126   :  { %120 = vmax.xlane.f32.xlu1 %v119_v33 }
 0x134   :  { %v139_v37 = vpop.xlane.xlu0 %138 }
 0x137   :  { %803 = vrot.lane.b32.xlu1 %v1868_v21, %s1754_s0 }
 0x138   :  { %v852_v26 = vpop.xlane.xlu0 %851 }
 0x139   :  { %v853_v27 = vsub.f32 %v1868_v21, %v852_v26 }
 0x13b   :  { %v854_v28 = vmul.f32 1.442695, %v853_v27 }
 0x15d   :  { %v135_v34 = vpop.xlane.xlu1 %134 }
 0x15e   :  { %1663 = vlog2.f32 %v135_v34 }
 0x15f   :  { %1665 = vrcp.f32 %v135_v34 }
 0x161   :  { %v124_v58 = vpop.xlane.xlu1 %123 }
 0x162   :  { %v126_v60 = vmul.f32 0.0625, %v124_v58 }
 0x164   :  { %v166_v6 = vmul.f32 %v1895_v62, %v126_v60 }
 0x16b   :  { %v1664_v35 = vpop.eup %1663 }
 0x16c   :  { %v1666_v36 = vpop.eup %1665  ;;  %v141_v38 = vmul.f32 0.6931472, %v1664_v35 }
 0x16d   :  { %v144_v39 = vmul.f32 %v1666_v36, %v139_v37 }
 0x16f   :  { %v145_v40 = vsub.f32 %v141_v38, %v144_v39 }
 0x171   :  { %v147_v41 = vsel %vm146_vm5, %v145_v40, inf  ;;  %v154_v42 = vsel %vm146_vm5, %v145_v40, -inf }
 0x172   :  { %v148_v43 = vrot.slane %v147_v41, 4  ;;  %v155_v44 = vrot.slane %v154_v42, 4 }
 0x174   :  { %v149_v45 = vmin.f32 %v147_v41, %v148_v43  ;;  %v156_v46 = vmax.f32 %v154_v42, %v155_v44  ;;  %v250_v43 = vld [vmem:[%s2117_s4] sm:$0xf] }
 0x176   :  { %v150_v47 = vrot.slane %v149_v45, 2  ;;  %v157_v48 = vrot.slane %v156_v46, 2 }
 0x178   :  { %v158_v49 = vmax.f32 %v156_v46, %v157_v48  ;;  %v151_v50 = vmin.f32 %v149_v45, %v150_v47  ;;  %v478_v46 = vld [vmem:[%s2118_s5] sm:$0xf]  ;;  %v422_v47 = vrot.slane %v1823_v1, 4  ;;  %v1138_v48 = vrot.slane %v1872_v22, 4 }
 0x17a   :  { %v159_v51 = vrot.slane %v158_v49, 1  ;;  %v152_v52 = vrot.slane %v151_v50, 1 }
 0x17c   :  { %v153_v53 = vmin.f32 %v151_v50, %v152_v52  ;;  %v160_v54 = vmax.f32 %v158_v49, %v159_v51  ;;  %v423_v49 = vmax.f32 %v1823_v1, %v422_v47  ;;  %v1139_v50 = vmax.f32 %v1872_v22, %v1138_v48 }
 0x17e   :  { %v162_v55 = vsub.f32 %v160_v54, %v153_v53  ;;  %v161_v61 = vsub.f32 %v145_v40, %v153_v53  ;;  %v329_v40 = vld [vmem:[%s2115_s2] sm:$0x7]  ;;  %v424_v51 = vrot.slane %v423_v49, 2  ;;  %v1140_v52 = vrot.slane %v1139_v50, 2 }
 0x180   :  { %1667 = vrcp.f32 %v162_v55  ;;  %v425_v53 = vmax.f32 %v423_v49, %v424_v51  ;;  %v1141_v54 = vmax.f32 %v1139_v50, %v1140_v52 }
 0x181   :  { %1669 = vpow2.f32 %v854_v28 }
 0x182   :  { %v426_v55 = vrot.slane %v425_v53, 1  ;;  %v1142_v56 = vrot.slane %v1141_v54, 1 }
 0x184   :  { %v427_v58 = vmax.f32 %v425_v53, %v426_v55 }
 0x186   :  { %v428_v60 = vsub.f32 %v1819_v0, %v427_v58 }
 0x18d   :  { %v1668_v59 = vpop.eup %1667 }
 0x18e   :  { %v165_v3 = vmul.f32 %v1668_v59, %v161_v61  ;;  %v1143_v59 = vmax.f32 %v1141_v54, %v1142_v56 }
 0x190   :  { %v169_v11 = vmul.f32 %v1901_v5, %v165_v3  ;;  %v1144_v61 = vsub.f32 %v1868_v21, %v1143_v59  ;;  %v429_v3 = vmul.f32 1.442695, %v428_v60 }
 0x192   :  { %1671 = vpow2.f32 %v429_v3 }
 0x1af   :  { %v121_v4 = vpop.xlane.xlu1 %120 }
 0x1b0   :  { %v167_v8 = vmul.f32 %v1898_v63, %v121_v4 }
 0x1b2   :  { %v168_v9 = vadd.f32 %v167_v8, %v166_v6 }
 0x1b3   :  { %v804_v12 = vpop.permute.xlu1 %803 }
 0x1b4   :  { %v170_v14 = vadd.f32 %v169_v11, %v168_v9  ;;  %806 = vst.msk [vmem:[#allocation2] sm:$0xf] %vm80_vm3, %v804_v12  ;;  %vm555_vm3 = vcmp.ge.s32.totalorder %v1889_v57, 1 }
 0x1b6   :  { %1586 = vmatpush3.msk.msra.mxu0 %vm146_vm5, %v170_v14 }
 0x1b7   :  { %1588 = vmatmul.mubr.msk.f32.vlgmr.msra.gmra.mxu0 %vm172_vm9, %v171_v15  ;;  %1595 = vmatprep.subr.mxu0 %v1753_v2 }
 0x1b8   :  { %1597 = vmatprep.mubr.msk.f32.mxu0 %vm1759_vm4, %v1753_v2  ;;  %1596 = vmatpush3.msk.msra.mxu0 %vm334_vm10, %v329_v40 }
 0x1b9   :  { %1605 = vmatprep.subr.mxu0 %v1753_v2 }
 0x1bb   :  { %v808_v16 = vld [vmem:[#allocation2] sm:$0xf] }
 0x1bc   :  { %v821_v18 = vmul.f32 %v808_v16, %v95_v10  ;;  %v813_v19 = vmul.f32 %v808_v16, %v87_v7  ;;  %v829_v23 = vmul.f32 %v808_v16, %v103_v13  ;;  %v837_v25 = vmul.f32 %v808_v16, %v111_v17  ;;  %v1670_v10 = vpop.eup %1669 }
 0x1bd   :  { %v859_v7 = vmul.f32 %v1670_v10, %v853_v27  ;;  %v1931_v13 = vsel %vm118_vm0, %v1868_v21, 0.0  ;;  %v856_v17 = vsel %vm118_vm0, %v1670_v10, 0.0  ;;  %v810_v30 = vmul.f32 %v808_v16, %v84_v24  ;;  %v1672_v6 = vpop.eup %1671 }
 0x1be   :  { %823 = vrot.lane.b32.xlu1 %v821_v18, %s1756_s17  ;;  %815 = vrot.lane.b32.xlu0 %v813_v19, %s1755_s16  ;;  %v464_v24 = vstv %s1943_s26  ;;  %v438_v1 = vmul.f32 %v1672_v6, %v428_v60  ;;  %v431_v9 = vsel %vm118_vm0, %v1672_v6, 0.0 }
 0x1bf   :  { %v860_v29 = vsel %vm118_vm0, %v859_v7, 0.0  ;;  %v1951_v45 = vmul.f32 %v464_v24, %v121_v4  ;;  %v1145_v4 = vmul.f32 1.442695, %v1144_v61  ;;  %v432_v11 = vrot.slane %v431_v9, 4 }
 0x1c0   :  { %v439_v12 = vsel %vm118_vm0, %v438_v1, 0.0 }
 0x1c1   :  { %1673 = vpow2.f32 %v1145_v4  ;;  %v433_v16 = vadd.f32 %v432_v11, %v431_v9  ;;  %v440_v19 = vrot.slane %v439_v12, 4 }
 0x1c2   :  { %831 = vrot.lane.b32.xlu1 %v829_v23, %s1757_s18  ;;  %839 = vrot.lane.b32.xlu0 %v837_v25, %s1758_s19 }
 0x1c3   :  { %v434_v25 = vrot.slane %v433_v16, 2  ;;  %v441_v10 = vadd.f32 %v440_v19, %v439_v12 }
 0x1c5   :  { %v435_v28 = vadd.f32 %v434_v25, %v433_v16 }
 0x1ce   :  { %v1674_v8 = vpop.eup %1673 }
 0x1cf   :  { %v1154_v22 = vmul.f32 %v1674_v8, %v1144_v61  ;;  %v1147_v14 = vsel %vm118_vm0, %v1674_v8, 0.0 }
 0x1d0   :  { %v1148_v15 = vrot.slane %v1147_v14, 4 }
 0x1d1   :  { %v1155_v18 = vsel %vm118_vm0, %v1154_v22, 0.0 }
 0x1d2   :  { %v1149_v23 = vadd.f32 %v1148_v15, %v1147_v14  ;;  %v1156_v27 = vrot.slane %v1155_v18, 4 }
 0x1d4   :  { %v1150_v26 = vrot.slane %v1149_v23, 2 }
 0x1d6   :  { %v1151_v7 = vadd.f32 %v1150_v26, %v1149_v23 }
 0x1e1   :  { %861 = vadd.xlane.f32.xlu0 %v860_v29  ;;  %v436_v29 = vrot.slane %v435_v28, 1 }
 0x1e5   :  { %847 = vadd.xlane.f32.xlu0 %v1931_v13 }
 0x1e6   :  { %857 = vadd.xlane.f32.xlu1 %v856_v17  ;;  %v1152_v17 = vrot.slane %v1151_v7, 1 }
 0x230   :  { %v824_v31 = vpop.permute.xlu1 %823  ;;  %v816_v32 = vpop.permute.xlu0 %815 }
 0x231   :  { %v818_v33 = vadd.f32 %v816_v32, %v810_v30  ;;  %v1157_v30 = vadd.f32 %v1156_v27, %v1155_v18  ;;  %v442_v32 = vrot.slane %v441_v10, 2 }
 0x233   :  { %v826_v34 = vadd.f32 %v824_v31, %v818_v33  ;;  %v437_v31 = vadd.f32 %v436_v29, %v435_v28  ;;  %v1153_v33 = vadd.f32 %v1152_v17, %v1151_v7 }
 0x234   :  { %v832_v35 = vpop.permute.xlu1 %831  ;;  %v840_v36 = vpop.permute.xlu0 %839 }
 0x235   :  { %v834_v37 = vadd.f32 %v832_v35, %v826_v34  ;;  %1675 = vlog2.f32 %v437_v31  ;;  %v1158_v34 = vrot.slane %v1157_v30, 2  ;;  %v443_v35 = vadd.f32 %v442_v32, %v441_v10 }
 0x236   :  { %1677 = vrcp.f32 %v437_v31 }
 0x237   :  { %v842_v38 = vadd.f32 %v840_v36, %v834_v37  ;;  %1679 = vlog2.f32 %v1153_v33  ;;  %v1159_v36 = vadd.f32 %v1158_v34, %v1157_v30  ;;  %v444_v37 = vrot.slane %v443_v35, 1 }
 0x238   :  { %1681 = vrcp.f32 %v1153_v33 }
 0x239   :  { %v843_v39 = vsel %vm118_vm0, %v842_v38, -inf  ;;  %v1160_v38 = vrot.slane %v1159_v36, 1 }
 0x23a   :  { %844 = vmax.xlane.f32.xlu1 %v843_v39  ;;  %v445_v39 = vadd.f32 %v444_v37, %v443_v35 }
 0x242   :  { %v1676_v40 = vpop.eup %1675 }
 0x26a   :  { %v862_v60 = vpop.xlane.xlu0 %861 }
 0x26e   :  { %v848_v27 = vpop.xlane.xlu0 %847 }
 0x26f   :  { %v858_v56 = vpop.xlane.xlu1 %857  ;;  %v849_v10 = vmul.f32 0.0625, %v848_v27 }
 0x270   :  { %1683 = vlog2.f32 %v858_v56 }
 0x271   :  { %1685 = vrcp.f32 %v858_v56  ;;  %v888_v30 = vmul.f32 %v1895_v62, %v849_v10  ;;  %v1529_v62 = vld [vmem:[%s2118_s5 + $0x4] sm:$0xf] }
 0x277   :  { %v245_v41 = vpop.f32.mrf.mxu0 }
 0x278   :  { %v249_v42 = vmax.f32 %v245_v41, 0.0  ;;  %v1161_v41 = vadd.f32 %v1160_v38, %v1159_v36  ;;  %v414_v36 = vrot.slane %v1862_v20, 4  ;;  %v1131_v38 = vrot.slane %v1931_v13, 4 }
 0x279   :  { %v1589_v44 = vpop.f32.mrf.mxu0 }
 0x27a   :  { %1591 = vmatpush3.msk.msra.mxu1 %vm255_vm11, %v249_v42  ;;  %v1678_v42 = vpop.eup %1677  ;;  %v415_v37 = vadd.f32 %v414_v36, %v1862_v20 }
 0x27b   :  { %1593 = vmatmul.mubr.msk.f32.vlgmr.msra.gmra.mxu1 %vm251_vm12, %v250_v43  ;;  %1600 = vmatprep.subr.mxu1 %v1753_v2  ;;  %v447_v43 = vmul.f32 0.6931472, %v1676_v40  ;;  %v1680_v44 = vpop.eup %1679  ;;  %v1132_v40 = vadd.f32 %v1131_v38, %v1931_v13 }
 0x27c   :  { %1601 = vmatpush3.msk.msra.mxu1 %vm146_vm5, %v1951_v45  ;;  %1602 = vmatprep.mubr.msk.f32.mxu1 %vm1759_vm4, %v1753_v2  ;;  %v1682_v47 = vpop.eup %1681  ;;  %v1163_v48 = vmul.f32 0.6931472, %v1680_v44 }
 0x27d   :  { %1610 = vmatprep.subr.mxu1 %v1753_v2  ;;  %v1166_v50 = vmul.f32 %v1682_v47, %v1161_v41  ;;  %v1684_v58 = vpop.eup %1683  ;;  %v1133_v44 = vrot.slane %v1132_v40, 2  ;;  %v1760_v47 = vmov 0  }
 0x27e   :  { %v1686_v59 = vpop.eup %1685  ;;  %v864_v61 = vmul.f32 0.6931472, %v1684_v58  ;;  %1659 = vset.pattern.permute.xlu1 %v1760_v47  ;;  %1660 = vset.pattern.permute.xlu0 %v1760_v47 }
 0x27f   :  { %1603 = vmatmul.mubr.msk.f32.vlgmr.msra.gmra.mxu1 %vm172_vm9, %v478_v46  ;;  %v450_v46 = vmul.f32 %v1678_v42, %v445_v39  ;;  %v1984_v53 = vsub.f32 %v1163_v48, %v1166_v50  ;;  %v867_v3 = vmul.f32 %v1686_v59, %v862_v60  ;;  %v416_v39 = vrot.slane %v415_v37, 2 }
 0x280   :  { %1611 = vmatpush3.msk.msra.mxu1 %vm146_vm5, %v1951_v45  ;;  %1612 = vmatprep.mubr.msk.f32.mxu1 %vm1759_vm4, %v1753_v2 }
 0x281   :  { %1620 = vmatprep.subr.mxu1 %v1753_v2  ;;  %v1980_v49 = vsub.f32 %v447_v43, %v450_v46  ;;  %v1168_v54 = vsel %vm452_vm13, %v1984_v53, inf  ;;  %v1171_v55 = vsel %vm452_vm13, %v1984_v53, -inf  ;;  %v868_v4 = vsub.f32 %v864_v61, %v867_v3 }
 0x282   :  { %v417_v43 = vadd.f32 %v416_v39, %v415_v37 }
 0x283   :  { %v453_v51 = vsel %vm452_vm13, %v1980_v49, inf  ;;  %v456_v52 = vsel %vm452_vm13, %v1980_v49, -inf  ;;  %v869_v6 = vsel %vm146_vm5, %v868_v4, inf  ;;  %v876_v1 = vsel %vm146_vm5, %v868_v4, -inf }
 0x284   :  { %454 = vmin.xlane.f32.xlu0 %v453_v51  ;;  %457 = vmax.xlane.f32.xlu1 %v456_v52  ;;  %v870_v8 = vrot.slane %v869_v6, 4  ;;  %v877_v22 = vrot.slane %v876_v1, 4  ;;  %v418_v20 = vrot.slane %v417_v43, 1 }
 0x286   :  { %v871_v9 = vmin.f32 %v869_v6, %v870_v8  ;;  %v878_v11 = vmax.f32 %v876_v1, %v877_v22  ;;  %v419_v56 = vadd.f32 %v418_v20, %v417_v43  ;;  %v469_v22 = vstv %s1509_s13 }
 0x288   :  { %1169 = vmin.xlane.f32.xlu0 %v1168_v54  ;;  %1172 = vmax.xlane.f32.xlu1 %v1171_v55  ;;  %v872_v12 = vrot.slane %v871_v9, 2  ;;  %v879_v14 = vrot.slane %v878_v11, 2  ;;  %v1134_v54 = vadd.f32 %v1133_v44, %v1132_v40  ;;  %v421_v60 = vmul.f32 0.25, %v419_v56 }
 0x28a   :  { %v873_v15 = vmin.f32 %v871_v9, %v872_v12  ;;  %v880_v16 = vmax.f32 %v878_v11, %v879_v14  ;;  %v1135_v13 = vrot.slane %v1134_v54, 1 }
 0x28c   :  { %v874_v18 = vrot.slane %v873_v15, 1  ;;  %v881_v19 = vrot.slane %v880_v16, 1  ;;  %v1136_v58 = vadd.f32 %v1135_v13, %v1134_v54 }
 0x28e   :  { %v875_v23 = vmin.f32 %v873_v15, %v874_v18  ;;  %v882_v25 = vmax.f32 %v880_v16, %v881_v19  ;;  %v1137_v6 = vmul.f32 0.25, %v1136_v58  ;;  %v1538_v19 = vld [vmem:[%s2119_s6 + $0x8] sm:$0xf] }
 0x290   :  { %v884_v26 = vsub.f32 %v882_v25, %v875_v23  ;;  %v883_v28 = vsub.f32 %v868_v4, %v875_v23  ;;  %v1560_v23 = vld [vmem:[%s2119_s6 + $0x8] sm:$0xf]  ;;  %v568_v25 = vld [vmem:[%s2119_s6] sm:$0xf] }
 0x292   :  { %1687 = vrcp.f32 %v884_v26  ;;  %v1048_v26 = vld [vmem:[%s2115_s2] sm:$0x7] }
 0x29f   :  { %v1688_v7 = vpop.eup %1687 }
 0x2a0   :  { %v887_v17 = vmul.f32 %v1688_v7, %v883_v28 }
 0x2a2   :  { %v891_v33 = vmul.f32 %v1901_v5, %v887_v17  ;;  %v893_v5 = vld [vmem:[%s2116_s3] sm:$0x3]  ;;  %s51_s3 = sld [smem:[#allocation4]] }
 0x2a8   :  { %s466_s14 = ssub.f32 0.0, %s51_s3 }
 0x2aa   :  { %v467_v3 = vstv %s466_s14 }
 0x2ab   :  { %v468_v8 = vmul.f32 %v467_v3, %v421_v60  ;;  %v1180_v14 = vmul.f32 %v1137_v6, %v467_v3  ;;  %v1532_v3 = vsel %vm658_vm6, 1.0, %v1753_v2 }
 0x2c3   :  { %v1990_v29 = vpop.xlane.xlu1 %844 }
 0x2c4   :  { %v889_v31 = vmul.f32 %v1898_v63, %v1990_v29 }
 0x2c6   :  { %v890_v32 = vadd.f32 %v889_v31, %v888_v30  ;;  %v971_v31 = vld [vmem:[%s2117_s4] sm:$0xf] }
 0x2c8   :  { %v892_v63 = vadd.f32 %v891_v33, %v890_v32  ;;  %v1179_v33 = vmul.f32 %v1990_v29, %v464_v24 }
 0x30d   :  { %v455_v41 = vpop.xlane.xlu0 %454  ;;  %v458_v42 = vpop.xlane.xlu1 %457 }
 0x30e   :  { %v460_v46 = vsub.f32 %v458_v42, %v455_v41  ;;  %v459_v59 = vsub.f32 %v1980_v49, %v455_v41  ;;  %v1556_v49 = vld [vmem:[%s2119_s6 + $0x4] sm:$0xf] }
 0x30f   :  { %v1553_v41 = vld [vmem:[%s2118_s5 + $0x4] sm:$0xf] }
 0x310   :  { %1689 = vrcp.f32 %v460_v46 }
 0x311   :  { %v1170_v51 = vpop.xlane.xlu0 %1169  ;;  %v1173_v52 = vpop.xlane.xlu1 %1172 }
 0x312   :  { %v1175_v55 = vsub.f32 %v1173_v52, %v1170_v51  ;;  %v1174_v4 = vsub.f32 %v1984_v53, %v1170_v51  ;;  %v1533_v53 = vld [vmem:[%s2119_s6 + $0x4] sm:$0xf] }
 0x314   :  { %1691 = vrcp.f32 %v1175_v55 }
 0x31d   :  { %v1690_v61 = vpop.eup %1689 }
 0x31e   :  { %v463_v1 = vmul.f32 %v1690_v61, %v459_v59 }
 0x320   :  { %v470_v9 = vmul.f32 %v469_v22, %v463_v1 }
 0x321   :  { %v1692_v11 = vpop.eup %1691 }
 0x322   :  { %v1178_v12 = vmul.f32 %v1692_v11, %v1174_v4  ;;  %v471_v15 = vadd.f32 %v470_v9, %v468_v8  ;;  %v1537_v11 = vsel %vm758_vm7, 1.0, %v1753_v2 }
 0x324   :  { %v1181_v16 = vmul.f32 %v1178_v12, %v469_v22  ;;  %473 = vrot.lane.b32.xlu0 %v471_v15, %s1761_s15 }
 0x326   :  { %v1182_v18 = vadd.f32 %v1181_v16, %v1180_v14 }
 0x328   :  { %1184 = vrot.lane.b32.xlu1 %v1182_v18, %s1761_s15  ;;  %1371 = vperm.xlu0 %1660, %v1556_v49  }
 0x32c   :  { %673 = vperm.xlu1 %1659, %v1533_v53  }
 0x330   :  { %773 = vperm.xlu1 %1659, %v1538_v19  }
 0x334   :  { %1464 = vperm.xlu1 %1659, %v1560_v23  }
 0x338   :  { %571 = vperm.xlu1 %1659, %v568_v25  }
 0x33b   :  { %v325_v34 = vpop.f32.mrf.mxu1 }
 0x33c   :  { %1598 = vmatmul.mubr.msk.f32.vlgmr.msra.gmra.mxu0 %vm330_vm14, %v325_v34  ;;  %v1188_v34 = vld [vmem:[%s2118_s5] sm:$0xf] }
 0x33d   :  { %1606 = vmatpush3.msk.msra.mxu0 %vm146_vm5, %v1951_v45  ;;  %v1594_v35 = vpop.f32.mrf.mxu1  ;;  %1607 = vmatprep.mubr.msk.f32.mxu0 %vm1759_vm4, %v1753_v2  ;;  %v1534_v45 = vld [vmem:[%s2118_s5 + $0x8] sm:$0xf] }
 0x33e   :  { %1615 = vmatprep.subr.mxu0 %v1753_v2  ;;  %1613 = vmatmul.mubr.msk.f32.vlgmr.msra.gmra.mxu1 %vm172_vm9, %v1534_v45  ;;  %v1273_v45 = vld [vmem:[%s2119_s6] sm:$0xf]  ;;  %s2085_s6 = sld [smem:[#allocation4 + $0x3]] }
 0x33f   :  { %1622 = vmatprep.mubr.msk.f32.mxu1 %vm1759_vm4, %v1753_v2  ;;  %v551_v48 = vpop.f32.mrf.mxu1  ;;  %1276 = vperm.xlu1 %1659, %v1273_v45  }
 0x340   :  { %1608 = vmatmul.mubr.msk.f32.vlgmr.msra.gmra.mxu0 %vm172_vm9, %v1529_v62  ;;  %563 = vperm.xlu0 %1660, %v551_v48   ;;  %v1557_v62 = vld [vmem:[%s2118_s5 + $0x8] sm:$0xf]  ;;  %s2099_s5 = sld [smem:[#allocation4 + $0x4]] }
 0x341   :  { %1616 = vmatpush3.msk.msra.mxu0 %vm146_vm5, %v892_v63  ;;  %1617 = vmatprep.mubr.msk.f32.mxu0 %vm1759_vm4, %v1753_v2  ;;  %v1604_v50 = vpop.f32.mrf.mxu1 }
 0x342   :  { %1625 = vmatprep.subr.mxu0 %v1753_v2 }
 0x344   :  { %1618 = vmatmul.mubr.msk.f32.vlgmr.msra.gmra.mxu0 %vm172_vm9, %v893_v5  ;;  %v788_v52 = vstv %s2085_s6 }
 0x345   :  { %1627 = vmatprep.mubr.msk.f32.mxu0 %vm1759_vm4, %v1753_v2  ;;  %1626 = vmatpush3.msk.msra.mxu0 %vm334_vm10, %v1048_v26 }
 0x346   :  { %1635 = vmatprep.subr.mxu0 %v1753_v2 }
 0x396   :  { %v474_v35 = vpop.permute.xlu0 %473 }
 0x397   :  { %477 = vst.msk [vmem:[#allocation3] sm:$0x1] %vm476_vm2, %v474_v35 }
 0x39a   :  { %v1185_v63 = vpop.permute.xlu1 %1184 }
 0x39e   :  { %v1528_v5 = vld [vmem:[#allocation3] ss:$0 sm:$0xff] }
 0x39f   :  { %1187 = vst.msk [vmem:[#allocation3] sm:$0x1] %vm476_vm2, %v1185_v63 }
 0x3a3   :  { %v1372_v56 = vpop.permute.xlu0 %1371 }
 0x3a7   :  { %v674_v46 = vpop.permute.xlu1 %673 }
 0x3a8   :  { %v676_v47 = vmul.f32 %v1528_v5, %v674_v46 }
 0x3ab   :  { %v774_v48 = vpop.permute.xlu1 %773 }
 0x3ac   :  { %v776_v50 = vmul.f32 %v1528_v5, %v774_v48 }
 0x3af   :  { %v1465_v13 = vpop.permute.xlu1 %1464 }
 0x3b3   :  { %v572_v60 = vpop.permute.xlu1 %571 }
 0x3b4   :  { %v580_v6 = vmul.f32 %v1528_v5, %v572_v60 }
 0x3ba   :  { %v1277_v45 = vpop.permute.xlu1 %1276 }
 0x3bb   :  { %v564_v58 = vpop.permute.xlu0 %563 }
 0x3fc   :  { %v404_v27 = vpop.f32.mrf.mxu0 }
 0x3fd   :  { %v408_v36 = vsub.f32 0.0, %v404_v27 }
 0x3fe   :  { %v1599_v28 = vpop.f32.mrf.mxu0  ;;  %v753_v24 = vpop.f32.mrf.mxu1 }
 0x3ff   :  { %v409_v37 = vmul.f32 1.442695, %v408_v36 }
 0x400   :  { %v653_v10 = vpop.f32.mrf.mxu0  ;;  %v1614_v29 = vpop.f32.mrf.mxu1 }
 0x401   :  { %1693 = vpow2.f32 %v409_v37 }
 0x402   :  { %v1609_v7 = vpop.f32.mrf.mxu0 }
 0x404   :  { %v966_v17 = vpop.f32.mrf.mxu0 }
 0x405   :  { %v970_v30 = vmax.f32 %v966_v17, 0.0 }
 0x406   :  { %v1619_v32 = vpop.f32.mrf.mxu0 }
 0x407   :  { %1621 = vmatpush3.msk.msra.mxu1 %vm255_vm11, %v970_v30 }
 0x408   :  { %1623 = vmatmul.mubr.msk.f32.vlgmr.msra.gmra.mxu1 %vm251_vm12, %v971_v31  ;;  %1630 = vmatprep.subr.mxu1 %v1753_v2 }
 0x409   :  { %1631 = vmatpush3.msk.msra.mxu1 %vm146_vm5, %v1179_v33  ;;  %1632 = vmatprep.mubr.msk.f32.mxu1 %vm1759_vm4, %v1753_v2 }
 0x40a   :  { %1640 = vmatprep.subr.mxu1 %v1753_v2 }
 0x40c   :  { %1633 = vmatmul.mubr.msk.f32.vlgmr.msra.gmra.mxu1 %vm172_vm9, %v1188_v34 }
 0x40d   :  { %1641 = vmatpush3.msk.msra.mxu1 %vm146_vm5, %v1179_v33  ;;  %1642 = vmatprep.mubr.msk.f32.mxu1 %vm1759_vm4, %v1753_v2 }
 0x40e   :  { %v1694_v38 = vpop.eup %1693 }
 0x40f   :  { %v411_v42 = vadd.f32 1.0, %v1694_v38 }
 0x410   :  { %1643 = vmatmul.mubr.msk.f32.vlgmr.msra.gmra.mxu1 %vm172_vm9, %v1557_v62 }
 0x411   :  { %1695 = vrcp.f32 %v411_v42 }
 0x41e   :  { %v1696_v51 = vpop.eup %1695 }
 0x41f   :  { %v789_v20 = vmul.f32 %v1696_v51, %v788_v52 }
 0x4c8   :  { %v1044_v39 = vpop.f32.mrf.mxu1 }
 0x4c9   :  { %1628 = vmatmul.mubr.msk.f32.vlgmr.msra.gmra.mxu0 %vm330_vm14, %v1044_v39 }
 0x4ca   :  { %1636 = vmatpush3.msk.msra.mxu0 %vm146_vm5, %v1179_v33  ;;  %v1624_v40 = vpop.f32.mrf.mxu1  ;;  %1637 = vmatprep.mubr.msk.f32.mxu0 %vm1759_vm4, %v1753_v2  ;;  %vm556_vm4 = vcmp.lt.s32.totalorder %v1889_v57, 17  ;;  %v790_v57 = vstv %s2099_s5 }
 0x4cb   :  { %vm557_vm5 = vmand %vm555_vm3, %vm556_vm4 }
 0x4cc   :  { %v1261_v43 = vpop.f32.mrf.mxu1  ;;  %v1527_v61 = vsel %vm557_vm5, 1.0, %v1753_v2 }
 0x4cd   :  { %1638 = vmatmul.mubr.msk.f32.vlgmr.msra.gmra.mxu0 %vm172_vm9, %v1553_v41  ;;  %1268 = vperm.xlu0 %1660, %v1261_v43   ;;  %v566_v1 = vmul.f32 %v1527_v61, %v564_v58 }
 0x4ce   :  { %v1634_v44 = vpop.f32.mrf.mxu1 }
 0x4cf   :  { %v581_v9 = vadd.f32 %v580_v6, %v566_v1 }
 0x4d0   :  { %v1450_v54 = vpop.f32.mrf.mxu1 }
 0x4d1   :  { %664 = vperm.xlu0 %1660, %v653_v10  }
 0x4d2   :  { %v1644_v55 = vpop.f32.mrf.mxu1 }
 0x4d5   :  { %764 = vperm.xlu0 %1660, %v753_v24   ;;  %v1552_v24 = vld [vmem:[#allocation3] ss:$0 sm:$0xff] }
 0x4d6   :  { %v1374_v29 = vmul.f32 %v1552_v24, %v1372_v56  ;;  %v1467_v35 = vmul.f32 %v1552_v24, %v1465_v13  ;;  %v1285_v38 = vmul.f32 %v1552_v24, %v1277_v45 }
 0x4d9   :  { %678 = vrot.lane.b32.xlu0 %v676_v47, %s1755_s16 }
 0x4dd   :  { %778 = vrot.lane.b32.xlu0 %v776_v50, %s1756_s17 }
 0x4e1   :  { %794 = vperm.xlu0 %1660, %v789_v20  }
 0x548   :  { %v1269_v59 = vpop.permute.xlu0 %1268 }
 0x549   :  { %v1271_v37 = vmul.f32 %v1527_v61, %v1269_v59 }
 0x54b   :  { %v1286_v41 = vadd.f32 %v1285_v38, %v1271_v37 }
 0x54c   :  { %v665_v4 = vpop.permute.xlu0 %664 }
 0x54d   :  { %v667_v8 = vmul.f32 %v1532_v3, %v665_v4 }
 0x54f   :  { %v668_v12 = vadd.f32 %v667_v8, %v581_v9 }
 0x550   :  { %v765_v22 = vpop.permute.xlu0 %764 }
 0x551   :  { %v767_v15 = vmul.f32 %v1537_v11, %v765_v22 }
 0x554   :  { %v679_v14 = vpop.permute.xlu0 %678 }
 0x555   :  { %v681_v16 = vadd.f32 %v679_v14, %v668_v12 }
 0x557   :  { %v768_v49 = vadd.f32 %v767_v15, %v681_v16 }
 0x558   :  { %v779_v18 = vpop.permute.xlu0 %778 }
 0x559   :  { %v781_v53 = vadd.f32 %v779_v18, %v768_v49 }
 0x55b   :  { %v782_v19 = vsub.f32 0.0, %v781_v53 }
 0x55c   :  { %v795_v2 = vpop.permute.xlu0 %794 }
 0x55d   :  { %v783_v23 = vmul.f32 1.442695, %v782_v19 }
 0x55f   :  { %1697 = vpow2.f32 %v783_v23 }
 0x56c   :  { %v1698_v25 = vpop.eup %1697 }
 0x56d   :  { %v785_v26 = vadd.f32 1.0, %v1698_v25 }
 0x56f   :  { %1699 = vrcp.f32 %v785_v26 }
 0x57c   :  { %v1700_v27 = vpop.eup %1699 }
 0x57d   :  { %v791_v28 = vmul.f32 %v1700_v27, %v790_v57 }
 0x57f   :  { %v797_v10 = vadd.f32 %v795_v2, %v791_v28 }
 0x581   :  { %v798_v7 = vmul.f32 %v797_v10, %v1819_v0 }
 0x583   :  { %799 = vst.msk [vmem:[#allocation9] sm:$0xf] %vm118_vm0, %v798_v7 }
 0x589   :  { %v1121_v17 = vpop.f32.mrf.mxu0 }
 0x58a   :  { %v1125_v30 = vsub.f32 0.0, %v1121_v17 }
 0x58b   :  { %v1629_v31 = vpop.f32.mrf.mxu0 }
 0x58c   :  { %v1126_v32 = vmul.f32 1.442695, %v1125_v30 }
 0x58d   :  { %v1357_v33 = vpop.f32.mrf.mxu0 }
 0x58e   :  { %1701 = vpow2.f32 %v1126_v32  ;;  %1363 = vperm.xlu1 %1659, %v1357_v33  }
 0x58f   :  { %v1639_v34 = vpop.f32.mrf.mxu0 }
 0x592   :  { %1456 = vperm.xlu1 %1659, %v1450_v54  }
 0x596   :  { %1376 = vrot.lane.b32.xlu1 %v1374_v29, %s1755_s16  ;;  %s1762_s16 = smov [#allocation9]  }
 0x59a   :  { %1469 = vrot.lane.b32.xlu1 %v1467_v35, %s1756_s17  ;;  %s1495_s17 = sshll.u32 %s1762_s16, 4  ;;  %s1496_s17 = int_to_ptr.vmem [resolvable:$true] %s1495_s17 }
 0x59b   :  { %v1702_v0 = vpop.eup %1701  ;;  %s1725_s3 = scalar_lea.vmem %s1496_s17, 128  ;;  %p1730_p1 = scmp.lt.s32.totalorder %s1496_s17, %s1496_s17 }
 0x59c   :  { %v1128_v62 = vadd.f32 1.0, %v1702_v0  ;;  %p1726_p0 = scmp.ne.s32.totalorder %s1496_s17, %s1725_s3  ;;  %p1731_p2 = scmp.lt.s32.totalorder %s1725_s3, %s1725_s3 }
 0x59e   :  { %1703 = vrcp.f32 %v1128_v62  ;;  %p1732_p3 = por %p1731_p2, %p1730_p1 }
 0x5a0   :  { %p1733_p4 = pnand %p1732_p3, %p1726_p0 }
 0x5ab   :  { %v1704_v63 = vpop.eup %1703 }
 0x5ac   :  { %v1479_v5 = vmul.f32 %v1704_v63, %v788_v52 }
 0x5ae   :  { %1483 = vperm.xlu1 %1659, %v1479_v5  }
 0x609   :  { %v1364_v36 = vpop.permute.xlu1 %1363 }
 0x60a   :  { %v1366_v39 = vmul.f32 %v1532_v3, %v1364_v36 }
 0x60c   :  { %v1367_v42 = vadd.f32 %v1366_v39, %v1286_v41 }
 0x60d   :  { %v1457_v40 = vpop.permute.xlu1 %1456 }
 0x60e   :  { %v1459_v44 = vmul.f32 %v1537_v11, %v1457_v40 }
 0x611   :  { %v1377_v43 = vpop.permute.xlu1 %1376 }
 0x612   :  { %v1379_v46 = vadd.f32 %v1377_v43, %v1367_v42 }
 0x614   :  { %v1460_v47 = vadd.f32 %v1459_v44, %v1379_v46 }
 0x615   :  { %v1470_v48 = vpop.permute.xlu1 %1469 }
 0x616   :  { %v1472_v50 = vadd.f32 %v1470_v48, %v1460_v47 }
 0x618   :  { %v1473_v51 = vsub.f32 0.0, %v1472_v50 }
 0x61a   :  { %v1474_v20 = vmul.f32 1.442695, %v1473_v51 }
 0x61c   :  { %1705 = vpow2.f32 %v1474_v20 }
 0x629   :  { %v1706_v54 = vpop.eup %1705  ;;  %v1484_v13 = vpop.permute.xlu1 %1483 }
 0x62a   :  { %v1476_v52 = vadd.f32 1.0, %v1706_v54 }
 0x62c   :  { %1707 = vrcp.f32 %v1476_v52 }
 0x639   :  { %v1708_v55 = vpop.eup %1707 }
 0x63a   :  { %v1480_v56 = vmul.f32 %v1708_v55, %v790_v57 }
 0x63c   :  { %v1486_v58 = vadd.f32 %v1484_v13, %v1480_v56 }
 0x63e   :  { %v1487_v59 = vmul.f32 %v1868_v21, %v1486_v58 }
 0x640   :  { %1489 = vst.msk [vmem:[#allocation9 + $0x4] sm:$0xf] %vm118_vm0, %v1487_v59 }
 0x641   :  { %1736 = shalt.err (!%p1733_p4)
}
 0x642   :  { %s1763_s13 = smov 64   ;;  %s1764_s14 = smov 4  }
 0x643   :  { %1501 = dma.vmem_to_hbm [thread:$0]  %s1496_s17, 128, %s2121_s8, [#allocation5], %s1763_s13, %s1763_s13, %s1764_s14  }
 0x644   :  { %1749 = dma.done.wait [#allocation5], 128  }
 0x645   :  { %1750 = vsyncadd [#allocation5], 4294967168 }
 0x646   :  { %1505 = vsyncpa [#allocation5], 1 }
 0x647   :  { %1506 = vsyncpa [#allocation6], 1 }
 0x648   :  { %1507 = vsyncpa [#allocation8], 1 }

</bundles_post_ra>
